<compile_context>
chip_gen: v6e
topology: v6e:2x2x1
jax: 0.10.0
libtpu: 0.0.40
codegen_flags: <defaults>
</compile_context>

<pallas_src>
import functools

import jax
import jax.numpy as jnp
from jax.experimental import pallas as pl
from jax.experimental.pallas import tpu as pltpu

IN_DIM = 1280
HID_DIM = 640
OUT_DIM = 5
OUT_PAD = 128  # lane-dense padded output width


def _round_up(n, m):
    return ((n + m - 1) // m) * m


def prepare_params(w1, b1, w2, b2):
    """One-time weight preprocessing.  Call once, NOT per forward pass.

    Takes PyTorch-layout Linear params (W:[out,in], b:[out]) and returns the
    kernel-ready operands: bf16 transposed W1, f32 b1 row, bf16 W2 transposed
    and zero-padded to 128 output lanes, f32 b2 row padded to 128.
    """
    w1_bf = jnp.asarray(w1, jnp.float32).T.astype(jnp.bfloat16)          # [1280, 640]
    b1_f = jnp.asarray(b1, jnp.float32).reshape(1, HID_DIM)              # [1, 640]
    w2_bf = jnp.asarray(w2, jnp.float32).T.astype(jnp.bfloat16)          # [640, 5]
    w2_p = jnp.zeros((HID_DIM, OUT_PAD), jnp.bfloat16).at[:, :OUT_DIM].set(w2_bf)
    b2_p = jnp.zeros((1, OUT_PAD), jnp.float32).at[0, :OUT_DIM].set(
        jnp.asarray(b2, jnp.float32).reshape(-1))
    return w1_bf, b1_f, w2_p, b2_p


def image_head_kernel(x_ref, w1_ref, b1_ref, w2_ref, b2_ref, o_ref):
    # x:[TB,1280] f32   w1:[1280,640] bf16   b1:[1,640] f32
    # w2:[640,128] bf16 (zero-padded cols)   b2:[1,128] f32   o:[TB,128] f32
    x_bf = x_ref[...].astype(jnp.bfloat16)                # VPU cast, no extra HBM pass
    h = jnp.dot(x_bf, w1_ref[...], preferred_element_type=jnp.float32)
    h = jnp.maximum(h + b1_ref[...], 0.0)                 # bias + ReLU in f32 (VPU)
    out = jnp.dot(h.astype(jnp.bfloat16), w2_ref[...],    # bf16 second matmul
                  preferred_element_type=jnp.float32)
    o_ref[...] = (out + b2_ref[...]).astype(o_ref.dtype)  # bias add in f32


@functools.partial(jax.jit, static_argnames=("batch_tile", "min_grid_tiles"))
def image_head(x, w1_bf, b1_f, w2_p, b2_p, *, batch_tile=512, min_grid_tiles=1):
    """Fused ImageHead forward.  batch_tile<=512 keeps VMEM within v5e's
    default scoped limit; pass min_grid_tiles=2 on v7x for 2-TC sharding."""
    B = x.shape[0]
    x = x.astype(jnp.float32)

    # Tile selection: minimize padded rows, 16-row granularity (bf16 sublane
    # packing), optionally force >=2 grid steps (v7x megacore).
    num_tiles = max(pl.cdiv(B, batch_tile), min_grid_tiles)
    tb = _round_up(pl.cdiv(B, num_tiles), 16)
    b_padded = num_tiles * tb
    if b_padded != B:
        x = jnp.pad(x, ((0, b_padded - B), (0, 0)))

    cost = pl.CostEstimate(
        flops=2 * b_padded * IN_DIM * HID_DIM + 2 * b_padded * HID_DIM * OUT_PAD,
        transcendentals=0,
        bytes_accessed=(x.size * 4 + w1_bf.size * 2 + b1_f.size * 4
                        + w2_p.size * 2 + b2_p.size * 4
                        + b_padded * OUT_PAD * 4),
    )

    # Grid-invariant operands: constant index_map + single buffer (no second
    # VMEM copy, DMA'd once and held resident across all grid steps).
    resident = functools.partial(pl.BlockSpec, pipeline_mode=pl.Buffered(1))

    out = pl.pallas_call(
        image_head_kernel,
        out_shape=jax.ShapeDtypeStruct((b_padded, OUT_PAD), jnp.float32),
        grid=(num_tiles,),
        in_specs=[
            pl.BlockSpec((tb, IN_DIM), lambda i: (i, 0)),    # x tile (double-buffered)
            resident((IN_DIM, HID_DIM), lambda i: (0, 0)),   # W1 bf16 (resident)
            resident((1, HID_DIM), lambda i: (0, 0)),        # b1 f32  (resident)
            resident((HID_DIM, OUT_PAD), lambda i: (0, 0)),  # W2 bf16 (resident)
            resident((1, OUT_PAD), lambda i: (0, 0)),        # b2 f32  (resident)
        ],
        out_specs=pl.BlockSpec((tb, OUT_PAD), lambda i: (i, 0)),
        compiler_params=pltpu.CompilerParams(
            dimension_semantics=("parallel",)),
        cost_estimate=cost,
    )(x, w1_bf, b1_f, w2_p, b2_p)

    # TODO(synk): consumers that can take the padded (b_padded, 128) slab (or a
    # bf16 output) directly would avoid this extra slice pass; kept here so the
    # function returns the module's exact [B, 5] f32 result.
    return out[:B, :OUT_DIM]


def reference(x, w1, b1, w2, b2):
    # Pure-JAX reference mirroring the kernel's bf16 quantization of both
    # matmuls' operands (accumulation / bias adds in f32).
    xb = x.astype(jnp.bfloat16).astype(jnp.float32)
    w1b = w1.T.astype(jnp.bfloat16).astype(jnp.float32)
    h = jnp.maximum(xb @ w1b + b1.reshape(1, -1), 0.0)
    hb = h.astype(jnp.bfloat16).astype(jnp.float32)
    w2b = w2.T.astype(jnp.bfloat16).astype(jnp.float32)
    return hb @ w2b + b2.reshape(1, -1)


if __name__ == "__main__":
    key = jax.random.PRNGKey(0)
    kx, k1, k2, k3, k4 = jax.random.split(key, 5)

    B = 8
    x = jax.random.normal(kx, (B, IN_DIM), dtype=jnp.float32)

    # PyTorch Linear init: uniform(-1/sqrt(fan_in), 1/sqrt(fan_in)),
    # PyTorch layout W:[out, in], b:[out].
    bound1 = 1.0 / (IN_DIM ** 0.5)
    bound2 = 1.0 / (HID_DIM ** 0.5)
    w1 = jax.random.uniform(k1, (HID_DIM, IN_DIM), jnp.float32, -bound1, bound1)
    b1 = jax.random.uniform(k2, (HID_DIM,), jnp.float32, -bound1, bound1)
    w2 = jax.random.uniform(k3, (OUT_DIM, HID_DIM), jnp.float32, -bound2, bound2)
    b2 = jax.random.uniform(k4, (OUT_DIM,), jnp.float32, -bound2, bound2)

    # One-time preprocessing (outside the per-call path).
    params = prepare_params(w1, b1, w2, b2)

    out = image_head(x, *params)
    out = jax.block_until_ready(out)

    ref = reference(x, w1, b1, w2, b2)
    assert out.shape == (B, OUT_DIM)
    assert jnp.allclose(out, ref, atol=2e-2, rtol=2e-2), (
        float(jnp.max(jnp.abs(out - ref))))
    print("KERNEL_OK")
</pallas_src>

<mosaic_0001>
module attributes {stable_mosaic.version = 11 : i64} {
  func.func @image_head_kernel(%arg0: i32, %arg1: memref<16x1280xf32, #tpu.memory_space<vmem>>, %arg2: memref<1280x640xbf16, #tpu.memory_space<vmem>>, %arg3: memref<1x640xf32, #tpu.memory_space<vmem>>, %arg4: memref<640x128xbf16, #tpu.memory_space<vmem>>, %arg5: memref<1x128xf32, #tpu.memory_space<vmem>>, %arg6: memref<16x128xf32, #tpu.memory_space<vmem>>) attributes {dimension_semantics = [#tpu.dimension_semantics<parallel>], iteration_bounds = array<i64: 1>, scalar_prefetch = 0 : i64, scratch_operands = 0 : i64, tpu.core_type = #tpu.core_type<tc>, window_params = [{transform_indices = @transform_0, window_bounds = array<i64: 16, 1280>}, {pipeline_mode = #tpu.pipeline_mode<synchronous>, transform_indices = @transform_1, window_bounds = array<i64: 1280, 640>}, {pipeline_mode = #tpu.pipeline_mode<synchronous>, transform_indices = @transform_2, window_bounds = array<i64: 1, 640>}, {pipeline_mode = #tpu.pipeline_mode<synchronous>, transform_indices = @transform_3, window_bounds = array<i64: 640, 128>}, {pipeline_mode = #tpu.pipeline_mode<synchronous>, transform_indices = @transform_4, window_bounds = array<i64: 1, 128>}, {transform_indices = @transform_5, window_bounds = array<i64: 16, 128>}]} {
    %c0 = arith.constant 0 : index
    %c0_0 = arith.constant 0 : index
    %0 = vector.load %arg1[%c0, %c0_0] : memref<16x1280xf32, #tpu.memory_space<vmem>>, vector<16x1280xf32>
    %1 = arith.truncf %0 : vector<16x1280xf32> to vector<16x1280xbf16>
    %c0_1 = arith.constant 0 : index
    %c0_2 = arith.constant 0 : index
    %2 = vector.load %arg2[%c0_1, %c0_2] : memref<1280x640xbf16, #tpu.memory_space<vmem>>, vector<1280x640xbf16>
    %cst = arith.constant dense<0.000000e+00> : vector<16x640xf32>
    %3 = tpu.matmul %1, %2, %cst {dimension_numbers = #tpu.dot_dimension_numbers<[1], [0], [0], [1], [0, 0, 1, 1], [], []>} : vector<16x1280xbf16>, vector<1280x640xbf16>, vector<16x640xf32> -> vector<16x640xf32>
    %c0_3 = arith.constant 0 : index
    %c0_4 = arith.constant 0 : index
    %4 = vector.load %arg3[%c0_3, %c0_4] : memref<1x640xf32, #tpu.memory_space<vmem>>, vector<1x640xf32>
    %5 = vector.broadcast %4 : vector<1x640xf32> to vector<16x640xf32>
    %6 = arith.addf %3, %5 : vector<16x640xf32>
    %cst_5 = arith.constant 0.000000e+00 : f32
    %7 = vector.broadcast %cst_5 : f32 to vector<16x640xf32>
    %8 = arith.maximumf %6, %7 : vector<16x640xf32>
    %9 = arith.truncf %8 : vector<16x640xf32> to vector<16x640xbf16>
    %c0_6 = arith.constant 0 : index
    %c0_7 = arith.constant 0 : index
    %10 = vector.load %arg4[%c0_6, %c0_7] : memref<640x128xbf16, #tpu.memory_space<vmem>>, vector<640x128xbf16>
    %cst_8 = arith.constant dense<0.000000e+00> : vector<16x128xf32>
    %11 = tpu.matmul %9, %10, %cst_8 {dimension_numbers = #tpu.dot_dimension_numbers<[1], [0], [0], [1], [0, 0, 1, 1], [], []>} : vector<16x640xbf16>, vector<640x128xbf16>, vector<16x128xf32> -> vector<16x128xf32>
    %c0_9 = arith.constant 0 : index
    %c0_10 = arith.constant 0 : index
    %12 = vector.load %arg5[%c0_9, %c0_10] : memref<1x128xf32, #tpu.memory_space<vmem>>, vector<1x128xf32>
    %13 = vector.broadcast %12 : vector<1x128xf32> to vector<16x128xf32>
    %14 = arith.addf %11, %13 : vector<16x128xf32>
    %c0_11 = arith.constant 0 : index
    %c0_12 = arith.constant 0 : index
    %15 = vector.load %arg6[%c0_11, %c0_12] : memref<16x128xf32, #tpu.memory_space<vmem>>, vector<16x128xf32>
    tpu.vector_store %arg6[%c0_11, %c0_12], %14 {strides = array<i32>} : memref<16x128xf32, #tpu.memory_space<vmem>>, vector<16x128xf32>,
    return
  }
  func.func @transform_0(%arg0: i32) -> (i32, i32) {
    %c0_i32 = arith.constant 0 : i32
    %c0_i32_0 = arith.constant 0 : i32
    return %arg0, %c0_i32 : i32, i32
  }
  func.func @transform_1(%arg0: i32) -> (i32, i32) {
    %c0_i32 = arith.constant 0 : i32
    %c0_i32_0 = arith.constant 0 : i32
    %c0_i32_1 = arith.constant 0 : i32
    return %c0_i32, %c0_i32_0 : i32, i32
  }
  func.func @transform_2(%arg0: i32) -> (i32, i32) {
    %c0_i32 = arith.constant 0 : i32
    %c0_i32_0 = arith.constant 0 : i32
    %c0_i32_1 = arith.constant 0 : i32
    return %c0_i32, %c0_i32_0 : i32, i32
  }
  func.func @transform_3(%arg0: i32) -> (i32, i32) {
    %c0_i32 = arith.constant 0 : i32
    %c0_i32_0 = arith.constant 0 : i32
    %c0_i32_1 = arith.constant 0 : i32
    return %c0_i32, %c0_i32_0 : i32, i32
  }
  func.func @transform_4(%arg0: i32) -> (i32, i32) {
    %c0_i32 = arith.constant 0 : i32
    %c0_i32_0 = arith.constant 0 : i32
    %c0_i32_1 = arith.constant 0 : i32
    return %c0_i32, %c0_i32_0 : i32, i32
  }
  func.func @transform_5(%arg0: i32) -> (i32, i32) {
    %c0_i32 = arith.constant 0 : i32
    %c0_i32_0 = arith.constant 0 : i32
    return %arg0, %c0_i32 : i32, i32
  }
}

</mosaic_0001>

<bundles_post_ra>
// kernel: image_head.1
= control target key start
LH: loop header
LB: loop body
LE: loop exit
PB: predicated region body
PF: predicated region fallthrough
CT: control target
= control target key end

     0   :  { %10 = vsyncpa [#allocation3], 0  ;;  %s5327_s0 = inlined_call_operand.vmem [shape: f32[16,1280], index: 0, kind: input, shape index: {}]   ;;  %s5328_s1 = inlined_call_operand.hbm [shape: bf16[1280,640], index: 1, kind: input, shape index: {}]   ;;  %s5329_s2 = inlined_call_operand.hbm [shape: f32[1,640], index: 2, kind: input, shape index: {}]   ;;  %s5330_s3 = inlined_call_operand.hbm [shape: bf16[640,128], index: 3, kind: input, shape index: {}]   ;;  %s5331_s4 = inlined_call_operand.hbm [shape: f32[1,128], index: 4, kind: input, shape index: {}]   ;;  %s5332_s5 = inlined_call_operand.vmem [shape: f32[16,128], index: 5, kind: output, shape index: {}]  }
   0x1   :  { %11 = vsyncpa [#allocation5], 0 }
   0x2   :  { %12 = vsyncpa [#allocation8], 0  ;;  %s5118_s18 = smov [#allocation4]   ;;  %s5119_s20 = smov [#allocation2]  }
   0x3   :  { %s33_s19 = sshll.u32 %s5118_s18, 4  ;;  %s20_s21 = sshll.u32 %s5119_s20, 4  ;;  %s34_s19 = int_to_ptr.vmem [resolvable:$true] %s33_s19  ;;  %s21_s21 = int_to_ptr.vmem [resolvable:$true] %s20_s21 }
   0x4   :  { %s5040_s22 = scalar_lea.vmem %s34_s19, 80  ;;  %s5044_s23 = scalar_lea.vmem %s34_s19, 96 }
   0x5   :  { %p5041_p0 = scmp.ne.s32.totalorder %s34_s19, %s5040_s22  ;;  %p5045_p1 = scmp.lt.s32.totalorder %s34_s19, %s34_s19 }
   0x6   :  { %p5046_p2 = scmp.lt.s32.totalorder %s5044_s23, %s5040_s22 }
   0x8   :  { %p5047_p3 = por %p5046_p2, %p5045_p1 }
   0xa   :  { %p5048_p4 = pnand %p5047_p3, %p5041_p0 }
   0xc   :  { %5051 = shalt.err (!%p5048_p4)
}
   0xd   :  { %36 = dma.hbm_to_vmem [thread:$0]  %s5329_s2, 80, %s34_s19, [#allocation5]  }
   0xe   :  { %s5060_s26 = scalar_lea.vmem %s21_s21, 51200  ;;  %p5065_p6 = scmp.lt.s32.totalorder %s21_s21, %s21_s21 }
   0xf   :  { %p5061_p5 = scmp.ne.s32.totalorder %s21_s21, %s5060_s26  ;;  %p5066_p7 = scmp.lt.s32.totalorder %s5060_s26, %s5060_s26 }
  0x11   :  { %p5067_p8 = por %p5066_p7, %p5065_p6 }
  0x13   :  { %p5068_p9 = pnand %p5067_p8, %p5061_p5 }
  0x15   :  { %5071 = shalt.err (!%p5068_p9)
}
  0x16   :  { %s5120_s27 = smov 320   ;;  %s5121_s28 = smov 20  }
  0x17   :  { %26 = dma.hbm_to_vmem [thread:$0]  %s5328_s1, 51200, %s21_s21, [#allocation3], %s5120_s27, %s5120_s27, %s5121_s28  }
  0x18   :  { %s5122_s6 = smov [#allocation6]  }
  0x19   :  { %s42_s7 = sshll.u32 %s5122_s6, 4  ;;  %s43_s7 = int_to_ptr.vmem [resolvable:$true] %s42_s7 }
  0x1a   :  { %s5080_s8 = scalar_lea.vmem %s43_s7, 5120  ;;  %p5085_p11 = scmp.lt.s32.totalorder %s43_s7, %s43_s7 }
  0x1b   :  { %p5081_p10 = scmp.ne.s32.totalorder %s43_s7, %s5080_s8  ;;  %p5086_p12 = scmp.lt.s32.totalorder %s5080_s8, %s5080_s8 }
  0x1d   :  { %p5087_p13 = por %p5086_p12, %p5085_p11 }
  0x1f   :  { %p5088_p0 = pnand %p5087_p13, %p5081_p10 }
  0x21   :  { %5091 = shalt.err (!%p5088_p0)
}
  0x22   :  { %s5123_s2 = smov 64   ;;  %s5124_s9 = smov 4  }
  0x23   :  { %48 = dma.hbm_to_vmem [thread:$0]  %s5330_s3, 5120, %s43_s7, [#allocation5], %s5123_s2, %s5123_s2, %s5124_s9  }
  0x24   :  { %s5125_s12 = smov [#allocation7]  }
  0x25   :  { %s55_s13 = sshll.u32 %s5125_s12, 4  ;;  %s56_s13 = int_to_ptr.vmem [resolvable:$true] %s55_s13 }
  0x26   :  { %s5100_s1 = scalar_lea.vmem %s56_s13, 16  ;;  %s5104_s14 = scalar_lea.vmem %s56_s13, 32 }
  0x27   :  { %p5101_p1 = scmp.ne.s32.totalorder %s56_s13, %s5100_s1  ;;  %p5105_p2 = scmp.lt.s32.totalorder %s56_s13, %s56_s13 }
  0x28   :  { %p5106_p3 = scmp.lt.s32.totalorder %s5104_s14, %s5100_s1 }
  0x2a   :  { %p5107_p4 = por %p5106_p3, %p5105_p2 }
  0x2c   :  { %p5108_p5 = pnand %p5107_p4, %p5101_p1 }
  0x2e   :  { %5111 = shalt.err (!%p5108_p5)
}
  0x2f   :  { %58 = dma.hbm_to_vmem [thread:$0]  %s5331_s4, 16, %s56_s13, [#allocation8]  }
  0x30   :  { %5112 = dma.done.wait [#allocation3], 51200  }
  0x31   :  { %5113 = vsyncadd [#allocation3], 4294916096 }
  0x32   :  { %5114 = dma.done.wait [#allocation5], 5200  }
  0x33   :  { %5115 = vsyncadd [#allocation5], 4294962096 }
  0x34   :  { %5116 = dma.done.wait [#allocation8], 16  }
  0x35   :  { %5117 = vsyncadd [#allocation8], 4294967280  ;;  %v4432_v0 = vld [vmem:[#allocation2 + $0x11c] ss:$20 sps:$4 sm:$0xff]   ;;  %v4436_v2 = vld [vmem:[#allocation2 + $0x118] ss:$20 sps:$4 sm:$0xff]  }
  0x36   :  { %v4434_v1 = vld [vmem:[#allocation2 + $0x39c] ss:$20 sps:$4 sm:$0xff]   ;;  %2689 = vmatprep.subr.bf16.mxu0 %v4432_v0  ;;  %v4437_v3 = vld [vmem:[#allocation2 + $0x398] ss:$20 sps:$4 sm:$0xff]   ;;  %v4438_v4 = vld [vmem:[#allocation2 + $0xf4] ss:$20 sps:$4 sm:$0xff]  }
  0x37   :  { %2732 = vmatprep.subr.bf16.mxu1 %v4434_v1  ;;  %2690 = vmatpush1.bf16.msra.mxu0 %v4436_v2  ;;  %v4440_v5 = vld [vmem:[#allocation2 + $0x374] ss:$20 sps:$4 sm:$0xff]   ;;  %v4442_v6 = vld [vmem:[#allocation2 + $0xf0] ss:$20 sps:$4 sm:$0xff]   ;;  %v4444_v8 = vld [vmem:[#allocation2 + $0xcc] ss:$20 sps:$4 sm:$0xff]  }
  0x38   :  { %2733 = vmatpush1.bf16.msra.mxu1 %v4437_v3  ;;  %2691 = vmatprep.subr.bf16.mxu0 %v4438_v4  ;;  %v4443_v7 = vld [vmem:[#allocation2 + $0x370] ss:$20 sps:$4 sm:$0xff]   ;;  %v4446_v9 = vld [vmem:[#allocation2 + $0x34c] ss:$20 sps:$4 sm:$0xff]   ;;  %v4448_v10 = vld [vmem:[#allocation2 + $0xc8] ss:$20 sps:$4 sm:$0xff]  }
  0x39   :  { %2734 = vmatprep.subr.bf16.mxu1 %v4440_v5  ;;  %v4449_v11 = vld [vmem:[#allocation2 + $0x348] ss:$20 sps:$4 sm:$0xff]   ;;  %v4450_v12 = vld [vmem:[#allocation2 + $0xa4] ss:$20 sps:$4 sm:$0xff]   ;;  %v4454_v14 = vld [vmem:[#allocation2 + $0xa0] ss:$20 sps:$4 sm:$0xff]  }
  0x3a   :  { %v4452_v13 = vld [vmem:[#allocation2 + $0x324] ss:$20 sps:$4 sm:$0xff]   ;;  %v4455_v15 = vld [vmem:[#allocation2 + $0x320] ss:$20 sps:$4 sm:$0xff]   ;;  %v4456_v16 = vld [vmem:[#allocation2 + $0x7c] ss:$20 sps:$4 sm:$0xff]  }
  0x3b   :  { %2692 = vmatpush1.bf16.msra.mxu0 %v4442_v6  ;;  %v4458_v17 = vld [vmem:[#allocation2 + $0x2fc] ss:$20 sps:$4 sm:$0xff]   ;;  %v4460_v18 = vld [vmem:[#allocation2 + $0x78] ss:$20 sps:$4 sm:$0xff]   ;;  %v4462_v20 = vld [vmem:[#allocation2 + $0x54] ss:$20 sps:$4 sm:$0xff]  }
  0x3c   :  { %2735 = vmatpush1.bf16.msra.mxu1 %v4443_v7  ;;  %2693 = vmatprep.subr.bf16.mxu0 %v4444_v8  ;;  %v4461_v19 = vld [vmem:[#allocation2 + $0x2f8] ss:$20 sps:$4 sm:$0xff]   ;;  %v4464_v21 = vld [vmem:[#allocation2 + $0x2d4] ss:$20 sps:$4 sm:$0xff]   ;;  %v4466_v22 = vld [vmem:[#allocation2 + $0x50] ss:$20 sps:$4 sm:$0xff]  }
  0x3d   :  { %2736 = vmatprep.subr.bf16.mxu1 %v4446_v9  ;;  %v4467_v23 = vld [vmem:[#allocation2 + $0x2d0] ss:$20 sps:$4 sm:$0xff]   ;;  %v4468_v24 = vld [vmem:[#allocation2 + $0x2c] ss:$20 sps:$4 sm:$0xff]   ;;  %v4472_v26 = vld [vmem:[#allocation2 + $0x28] ss:$20 sps:$4 sm:$0xff]  }
  0x3e   :  { %v4470_v25 = vld [vmem:[#allocation2 + $0x2ac] ss:$20 sps:$4 sm:$0xff]   ;;  %v4473_v27 = vld [vmem:[#allocation2 + $0x2a8] ss:$20 sps:$4 sm:$0xff]   ;;  %v4474_v28 = vld [vmem:[#allocation2 + $0x4] ss:$20 sps:$4 sm:$0xff]  }
  0x3f   :  { %2694 = vmatpush1.bf16.msra.mxu0 %v4448_v10  ;;  %v4476_v29 = vld [vmem:[#allocation2 + $0x284] ss:$20 sps:$4 sm:$0xff]   ;;  %v4478_v30 = vld [vmem:[#allocation2] ss:$20 sps:$4 sm:$0xff]   ;;  %v4480_v32 = vld [vmem:[#allocation2 + $0x25c] ss:$20 sps:$4 sm:$0xff]  }
  0x40   :  { %2737 = vmatpush1.bf16.msra.mxu1 %v4449_v11  ;;  %2695 = vmatprep.subr.bf16.mxu0 %v4450_v12  ;;  %v4479_v31 = vld [vmem:[#allocation2 + $0x280] ss:$20 sps:$4 sm:$0xff]   ;;  %v4482_v33 = vld [vmem:[#allocation2 + $0x4dc] ss:$20 sps:$4 sm:$0xff]   ;;  %v4484_v34 = vld [vmem:[#allocation2 + $0x258] ss:$20 sps:$4 sm:$0xff]  }
  0x41   :  { %2738 = vmatprep.subr.bf16.mxu1 %v4452_v13  ;;  %v4485_v35 = vld [vmem:[#allocation2 + $0x4d8] ss:$20 sps:$4 sm:$0xff]   ;;  %v4486_v36 = vld [vmem:[#allocation2 + $0x234] ss:$20 sps:$4 sm:$0xff]   ;;  %v4490_v38 = vld [vmem:[#allocation2 + $0x230] ss:$20 sps:$4 sm:$0xff]  }
  0x42   :  { %v4488_v37 = vld [vmem:[#allocation2 + $0x4b4] ss:$20 sps:$4 sm:$0xff]   ;;  %v4491_v39 = vld [vmem:[#allocation2 + $0x4b0] ss:$20 sps:$4 sm:$0xff]   ;;  %v4492_v40 = vld [vmem:[#allocation2 + $0x20c] ss:$20 sps:$4 sm:$0xff]  }
  0x43   :  { %2696 = vmatpush1.bf16.msra.mxu0 %v4454_v14  ;;  %v4494_v41 = vld [vmem:[#allocation2 + $0x48c] ss:$20 sps:$4 sm:$0xff]   ;;  %v4496_v42 = vld [vmem:[#allocation2 + $0x208] ss:$20 sps:$4 sm:$0xff]   ;;  %v4498_v44 = vld [vmem:[#allocation2 + $0x1e4] ss:$20 sps:$4 sm:$0xff]  }
  0x44   :  { %2739 = vmatpush1.bf16.msra.mxu1 %v4455_v15  ;;  %2697 = vmatprep.subr.bf16.mxu0 %v4456_v16  ;;  %v4497_v43 = vld [vmem:[#allocation2 + $0x488] ss:$20 sps:$4 sm:$0xff]   ;;  %v4500_v45 = vld [vmem:[#allocation2 + $0x464] ss:$20 sps:$4 sm:$0xff]   ;;  %v4502_v47 = vld [vmem:[#allocation2 + $0x1e0] ss:$20 sps:$4 sm:$0xff]  }
  0x45   :  { %2740 = vmatprep.subr.bf16.mxu1 %v4458_v17  ;;  %v73_v46 = vld [vmem:[%s5327_s0 + $0x8] sm:$0xff]  ;;  %v4503_v48 = vld [vmem:[#allocation2 + $0x460] ss:$20 sps:$4 sm:$0xff]   ;;  %v83_v49 = vld [vmem:[%s5327_s0 + $0x58] sm:$0xff]  ;;  %vm5127_vm0 = vmmov 0  }
  0x46   :  { %v5176_v50 = vpack.c.bf16 %v83_v49, %v73_v46  ;;  %v75_v51 = vld [vmem:[%s5327_s0 + $0x18] sm:$0xff]  ;;  %v85_v52 = vld [vmem:[%s5327_s0 + $0x68] sm:$0xff]  ;;  %v4514_v60 = vld [vmem:[#allocation2 + $0x190] ss:$20 sps:$4 sm:$0xff]  }
  0x47   :  { %2698 = vmatpush1.bf16.msra.mxu0 %v4460_v18  ;;  %v4504_v53 = vld [vmem:[#allocation2 + $0x1bc] ss:$20 sps:$4 sm:$0xff]   ;;  %v5184_v55 = vpack.c.bf16 %v85_v52, %v75_v51  ;;  %v4508_v56 = vld [vmem:[#allocation2 + $0x1b8] ss:$20 sps:$4 sm:$0xff]   ;;  %v4510_v58 = vld [vmem:[#allocation2 + $0x194] ss:$20 sps:$4 sm:$0xff]  }
  0x48   :  { %2741 = vmatpush1.bf16.msra.mxu1 %v4461_v19  ;;  %2699 = vmatprep.subr.bf16.mxu0 %v4462_v20  ;;  %v4506_v54 = vld [vmem:[#allocation2 + $0x43c] ss:$20 sps:$4 sm:$0xff]   ;;  %v4509_v57 = vld [vmem:[#allocation2 + $0x438] ss:$20 sps:$4 sm:$0xff]   ;;  %v4512_v59 = vld [vmem:[#allocation2 + $0x414] ss:$20 sps:$4 sm:$0xff]  }
  0x49   :  { %2742 = vmatprep.subr.bf16.mxu1 %v4464_v21  ;;  %2721 = vmatprep.mubr.bf16.mxu0 %v5176_v50  ;;  %v4515_v61 = vld [vmem:[#allocation2 + $0x410] ss:$20 sps:$4 sm:$0xff]   ;;  %v4516_v62 = vld [vmem:[#allocation2 + $0x16c] ss:$20 sps:$4 sm:$0xff]   ;;  %v4520_v0 = vld [vmem:[#allocation2 + $0x168] ss:$20 sps:$4 sm:$0xff]  }
  0x4a   :  { %2764 = vmatprep.mubr.bf16.mxu1 %v5184_v55  ;;  %v4518_v63 = vld [vmem:[#allocation2 + $0x3ec] ss:$20 sps:$4 sm:$0xff]   ;;  %v4521_v1 = vld [vmem:[#allocation2 + $0x3e8] ss:$20 sps:$4 sm:$0xff]   ;;  %v4522_v2 = vld [vmem:[#allocation2 + $0x144] ss:$20 sps:$4 sm:$0xff]  }
  0x4b   :  { %2700 = vmatpush1.bf16.msra.mxu0 %v4466_v22  ;;  %v4524_v3 = vld [vmem:[#allocation2 + $0x3c4] ss:$20 sps:$4 sm:$0xff]   ;;  %v4526_v4 = vld [vmem:[#allocation2 + $0x140] ss:$20 sps:$4 sm:$0xff]   ;;  %v4530_v8 = vld [vmem:[#allocation2 + $0x61c] ss:$20 sps:$4 sm:$0xff]  }
  0x4c   :  { %2743 = vmatpush1.bf16.msra.mxu1 %v4467_v23  ;;  %2701 = vmatprep.subr.bf16.mxu0 %v4468_v24  ;;  %v4527_v5 = vld [vmem:[#allocation2 + $0x3c0] ss:$20 sps:$4 sm:$0xff]   ;;  %v4533_v11 = vld [vmem:[#allocation2 + $0x89c] ss:$20 sps:$4 sm:$0xff]   ;;  %v4528_v13 = vld [vmem:[#allocation2 + $0x618] ss:$20 sps:$4 sm:$0xff]  }
  0x4d   :  { %2744 = vmatprep.subr.bf16.mxu1 %v4470_v25  ;;  %v72_v6 = vld [vmem:[%s5327_s0] sm:$0xff]  ;;  %v82_v7 = vld [vmem:[%s5327_s0 + $0x50] sm:$0xff]  ;;  %v4531_v14 = vld [vmem:[#allocation2 + $0x898] ss:$20 sps:$4 sm:$0xff]  }
  0x4e   :  { %v74_v9 = vld [vmem:[%s5327_s0 + $0x10] sm:$0xff]  ;;  %v84_v10 = vld [vmem:[%s5327_s0 + $0x60] sm:$0xff]  ;;  %v5200_v12 = vpack.c.bf16 %v82_v7, %v72_v6  ;;  %v4540_v22 = vld [vmem:[#allocation2 + $0x5c8] ss:$20 sps:$4 sm:$0xff]  }
  0x4f   :  { %2702 = vmatpush1.bf16.msra.mxu0 %v4472_v26  ;;  %v5202_v15 = vpack.c.bf16 %v84_v10, %v74_v9  ;;  %v4536_v16 = vld [vmem:[#allocation2 + $0x5f4] ss:$20 sps:$4 sm:$0xff]   ;;  %v4534_v18 = vld [vmem:[#allocation2 + $0x5f0] ss:$20 sps:$4 sm:$0xff]   ;;  %v4542_v20 = vld [vmem:[#allocation2 + $0x5cc] ss:$20 sps:$4 sm:$0xff]  }
  0x50   :  { %2745 = vmatpush1.bf16.msra.mxu1 %v4473_v27  ;;  %2703 = vmatprep.subr.bf16.mxu0 %v4474_v28  ;;  %v4539_v17 = vld [vmem:[#allocation2 + $0x874] ss:$20 sps:$4 sm:$0xff]   ;;  %v4537_v19 = vld [vmem:[#allocation2 + $0x870] ss:$20 sps:$4 sm:$0xff]   ;;  %v4545_v21 = vld [vmem:[#allocation2 + $0x84c] ss:$20 sps:$4 sm:$0xff]  }
  0x51   :  { %2746 = vmatprep.subr.bf16.mxu1 %v4476_v29  ;;  %v4543_v23 = vld [vmem:[#allocation2 + $0x848] ss:$20 sps:$4 sm:$0xff]   ;;  %v4548_v24 = vld [vmem:[#allocation2 + $0x5a4] ss:$20 sps:$4 sm:$0xff]   ;;  %v4546_v26 = vld [vmem:[#allocation2 + $0x5a0] ss:$20 sps:$4 sm:$0xff]  }
  0x52   :  { %v4551_v25 = vld [vmem:[#allocation2 + $0x824] ss:$20 sps:$4 sm:$0xff]   ;;  %v4549_v27 = vld [vmem:[#allocation2 + $0x820] ss:$20 sps:$4 sm:$0xff]   ;;  %v4554_v28 = vld [vmem:[#allocation2 + $0x57c] ss:$20 sps:$4 sm:$0xff]  }
  0x53   :  { %2704 = vmatpush1.bf16.msra.mxu0 %v4478_v30  ;;  %v4557_v29 = vld [vmem:[#allocation2 + $0x7fc] ss:$20 sps:$4 sm:$0xff]   ;;  %v4552_v30 = vld [vmem:[#allocation2 + $0x578] ss:$20 sps:$4 sm:$0xff]   ;;  %v4573_v49 = vld [vmem:[#allocation2 + $0x780] ss:$20 sps:$4 sm:$0xff]  }
  0x54   :  { %2747 = vmatpush1.bf16.msra.mxu1 %v4479_v31  ;;  %2705 = vmatprep.subr.bf16.mxu0 %v4480_v32  ;;  %v4555_v31 = vld [vmem:[#allocation2 + $0x7f8] ss:$20 sps:$4 sm:$0xff]   ;;  %v4560_v32 = vld [vmem:[#allocation2 + $0x554] ss:$20 sps:$4 sm:$0xff]   ;;  %v4578_v51 = vld [vmem:[#allocation2 + $0x75c] ss:$20 sps:$4 sm:$0xff]  }
  0x55   :  { %2748 = vmatprep.subr.bf16.mxu1 %v4482_v33  ;;  %v4563_v33 = vld [vmem:[#allocation2 + $0x7d4] ss:$20 sps:$4 sm:$0xff]   ;;  %v4581_v52 = vld [vmem:[#allocation2 + $0x9dc] ss:$20 sps:$4 sm:$0xff]   ;;  %v4600_v6 = vld [vmem:[#allocation2 + $0x6b8] ss:$20 sps:$4 sm:$0xff]  }
  0x56   :  { %v89_v46 = vld [vmem:[%s5327_s0 + $0x88] sm:$0xff]  ;;  %v4606_v10 = vld [vmem:[#allocation2 + $0x690] ss:$20 sps:$4 sm:$0xff]  }
  0x57   :  { %2706 = vmatpush2.bf16.msra.mxu0 %v4484_v34  ;;  %v4558_v34 = vld [vmem:[#allocation2 + $0x550] ss:$20 sps:$4 sm:$0xff]   ;;  %v4603_v7 = vld [vmem:[#allocation2 + $0x938] ss:$20 sps:$4 sm:$0xff]   ;;  %v4611_v9 = vld [vmem:[#allocation2 + $0x914] ss:$20 sps:$4 sm:$0xff]  }
  0x58   :  { %2749 = vmatpush2.bf16.msra.mxu1 %v4485_v35  ;;  %2707 = vmatprep.subr.bf16.mxu0 %v4486_v36  ;;  %v4561_v35 = vld [vmem:[#allocation2 + $0x7d0] ss:$20 sps:$4 sm:$0xff]   ;;  %v4566_v36 = vld [vmem:[#allocation2 + $0x52c] ss:$20 sps:$4 sm:$0xff]  }
  0x59   :  { %2750 = vmatprep.subr.bf16.mxu1 %v4488_v37  ;;  %v4569_v37 = vld [vmem:[#allocation2 + $0x7ac] ss:$20 sps:$4 sm:$0xff]  }
  0x5b   :  { %2708 = vmatpush2.bf16.msra.mxu0 %v4490_v38  ;;  %v4564_v38 = vld [vmem:[#allocation2 + $0x528] ss:$20 sps:$4 sm:$0xff]  }
  0x5c   :  { %2751 = vmatpush2.bf16.msra.mxu1 %v4491_v39  ;;  %2709 = vmatprep.subr.bf16.mxu0 %v4492_v40  ;;  %v4567_v39 = vld [vmem:[#allocation2 + $0x7a8] ss:$20 sps:$4 sm:$0xff]   ;;  %v4572_v40 = vld [vmem:[#allocation2 + $0x504] ss:$20 sps:$4 sm:$0xff]  }
  0x5d   :  { %2752 = vmatprep.subr.bf16.mxu1 %v4494_v41  ;;  %v77_v41 = vld [vmem:[%s5327_s0 + $0x28] sm:$0xff] }
  0x5f   :  { %2710 = vmatpush2.bf16.msra.mxu0 %v4496_v42  ;;  %v87_v42 = vld [vmem:[%s5327_s0 + $0x78] sm:$0xff] }
  0x60   :  { %2753 = vmatpush2.bf16.msra.mxu1 %v4497_v43  ;;  %2711 = vmatprep.subr.bf16.mxu0 %v4498_v44  ;;  %v4575_v43 = vld [vmem:[#allocation2 + $0x784] ss:$20 sps:$4 sm:$0xff]   ;;  %v5212_v44 = vpack.c.bf16 %v87_v42, %v77_v41  ;;  %v4636_v41 = vld [vmem:[#allocation2 + $0xac8] ss:$20 sps:$4 sm:$0xff]  }
  0x61   :  { %2754 = vmatprep.subr.bf16.mxu1 %v4500_v45  ;;  %v79_v45 = vld [vmem:[%s5327_s0 + $0x38] sm:$0xff]  ;;  %v4639_v42 = vld [vmem:[#allocation2 + $0xd0] ss:$20 sps:$4 sm:$0xff]  }
  0x63   :  { %2712 = vmatpush2.bf16.msra.mxu0 %v4502_v47  ;;  %v5220_v47 = vpack.c.bf16 %v89_v46, %v79_v45  ;;  %v4647_v45 = vld [vmem:[#allocation2 + $0xac] ss:$20 sps:$4 sm:$0xff]  }
  0x64   :  { %2755 = vmatpush2.bf16.msra.mxu1 %v4503_v48  ;;  %2713 = vmatprep.subr.bf16.mxu0 %v4504_v53  ;;  %v4570_v48 = vld [vmem:[#allocation2 + $0x500] ss:$20 sps:$4 sm:$0xff]   ;;  %v4576_v53 = vld [vmem:[#allocation2 + $0x758] ss:$20 sps:$4 sm:$0xff]  }
  0x65   :  { %2756 = vmatprep.subr.bf16.mxu1 %v4506_v54  ;;  %v4579_v54 = vld [vmem:[#allocation2 + $0x9d8] ss:$20 sps:$4 sm:$0xff]   ;;  %v4642_v46 = vld [vmem:[#allocation2 + $0xaa0] ss:$20 sps:$4 sm:$0xff]  }
  0x67   :  { %2714 = vmatpush2.bf16.msra.mxu0 %v4508_v56  ;;  %v4584_v56 = vld [vmem:[#allocation2 + $0x734] ss:$20 sps:$4 sm:$0xff]  }
  0x68   :  { %2757 = vmatpush2.bf16.msra.mxu1 %v4509_v57  ;;  %2715 = vmatprep.subr.bf16.mxu0 %v4510_v58  ;;  %v4587_v57 = vld [vmem:[#allocation2 + $0x9b4] ss:$20 sps:$4 sm:$0xff]   ;;  %v4582_v58 = vld [vmem:[#allocation2 + $0x730] ss:$20 sps:$4 sm:$0xff]  }
  0x69   :  { %2758 = vmatprep.subr.bf16.mxu1 %v4512_v59  ;;  %v4585_v59 = vld [vmem:[#allocation2 + $0x9b0] ss:$20 sps:$4 sm:$0xff]  }
  0x6b   :  { %2716 = vmatpush2.bf16.msra.mxu0 %v4514_v60  ;;  %v4590_v60 = vld [vmem:[#allocation2 + $0x70c] ss:$20 sps:$4 sm:$0xff]  }
  0x6c   :  { %2759 = vmatpush2.bf16.msra.mxu1 %v4515_v61  ;;  %2717 = vmatprep.subr.bf16.mxu0 %v4516_v62  ;;  %v4593_v61 = vld [vmem:[#allocation2 + $0x98c] ss:$20 sps:$4 sm:$0xff]   ;;  %v4588_v62 = vld [vmem:[#allocation2 + $0x708] ss:$20 sps:$4 sm:$0xff]  }
  0x6d   :  { %2760 = vmatprep.subr.bf16.mxu1 %v4518_v63  ;;  %v4591_v63 = vld [vmem:[#allocation2 + $0x988] ss:$20 sps:$4 sm:$0xff]  }
  0x6f   :  { %2718 = vmatpush2.bf16.msra.mxu0 %v4520_v0  ;;  %v4596_v0 = vld [vmem:[#allocation2 + $0x6e4] ss:$20 sps:$4 sm:$0xff]  }
  0x70   :  { %2761 = vmatpush2.bf16.msra.mxu1 %v4521_v1  ;;  %2719 = vmatprep.subr.bf16.mxu0 %v4522_v2  ;;  %v4599_v1 = vld [vmem:[#allocation2 + $0x964] ss:$20 sps:$4 sm:$0xff]   ;;  %v4594_v2 = vld [vmem:[#allocation2 + $0x6e0] ss:$20 sps:$4 sm:$0xff]  }
  0x71   :  { %2762 = vmatprep.subr.bf16.mxu1 %v4524_v3  ;;  %v4597_v3 = vld [vmem:[#allocation2 + $0x960] ss:$20 sps:$4 sm:$0xff]  }
  0x73   :  { %2720 = vmatpush2.bf16.msra.mxu0 %v4526_v4  ;;  %v4602_v4 = vld [vmem:[#allocation2 + $0x6bc] ss:$20 sps:$4 sm:$0xff]  }
  0x74   :  { %2763 = vmatpush2.bf16.msra.mxu1 %v4527_v5  ;;  %2775 = vmatprep.subr.bf16.mxu0 %v4530_v8  ;;  %v4605_v5 = vld [vmem:[#allocation2 + $0x93c] ss:$20 sps:$4 sm:$0xff]   ;;  %v4608_v8 = vld [vmem:[#allocation2 + $0x694] ss:$20 sps:$4 sm:$0xff]  }
  0x75   :  { %2818 = vmatprep.subr.bf16.mxu1 %v4533_v11  ;;  %v4609_v11 = vld [vmem:[#allocation2 + $0x910] ss:$20 sps:$4 sm:$0xff]  }
  0x76   :  { %2722 = vmatmul.mubr.bf16.vlgmr.msra.gmra.mxu0 %v5200_v12 }
  0x77   :  { %2765 = vmatmul.mubr.bf16.vlgmr.msra.gmra.mxu1 %v5202_v15  ;;  %2776 = vmatpush1.bf16.msra.mxu0 %v4528_v13  ;;  %v4614_v13 = vld [vmem:[#allocation2 + $0x66c] ss:$20 sps:$4 sm:$0xff]  }
  0x78   :  { %2819 = vmatpush1.bf16.msra.mxu1 %v4531_v14  ;;  %2777 = vmatprep.subr.bf16.mxu0 %v4536_v16  ;;  %v4617_v14 = vld [vmem:[#allocation2 + $0x8ec] ss:$20 sps:$4 sm:$0xff]   ;;  %v4612_v16 = vld [vmem:[#allocation2 + $0x668] ss:$20 sps:$4 sm:$0xff]  }
  0x79   :  { %2820 = vmatprep.subr.bf16.mxu1 %v4539_v17  ;;  %2807 = vmatprep.mubr.bf16.mxu0 %v5212_v44  ;;  %v4615_v17 = vld [vmem:[#allocation2 + $0x8e8] ss:$20 sps:$4 sm:$0xff]  }
  0x7a   :  { %2850 = vmatprep.mubr.bf16.mxu1 %v5220_v47 }
  0x7b   :  { %2778 = vmatpush1.bf16.msra.mxu0 %v4534_v18  ;;  %v4620_v18 = vld [vmem:[#allocation2 + $0x644] ss:$20 sps:$4 sm:$0xff]  }
  0x7c   :  { %2821 = vmatpush1.bf16.msra.mxu1 %v4537_v19  ;;  %2779 = vmatprep.subr.bf16.mxu0 %v4542_v20  ;;  %v4623_v19 = vld [vmem:[#allocation2 + $0x8c4] ss:$20 sps:$4 sm:$0xff]   ;;  %v4618_v20 = vld [vmem:[#allocation2 + $0x640] ss:$20 sps:$4 sm:$0xff]  }
  0x7d   :  { %2822 = vmatprep.subr.bf16.mxu1 %v4545_v21  ;;  %v4621_v21 = vld [vmem:[#allocation2 + $0x8c0] ss:$20 sps:$4 sm:$0xff]  }
  0x7f   :  { %2780 = vmatpush1.bf16.msra.mxu0 %v4540_v22  ;;  %v76_v22 = vld [vmem:[%s5327_s0 + $0x20] sm:$0xff] }
  0x80   :  { %2823 = vmatpush1.bf16.msra.mxu1 %v4543_v23  ;;  %2781 = vmatprep.subr.bf16.mxu0 %v4548_v24  ;;  %v86_v23 = vld [vmem:[%s5327_s0 + $0x70] sm:$0xff] }
  0x81   :  { %2824 = vmatprep.subr.bf16.mxu1 %v4551_v25  ;;  %v4626_v24 = vld [vmem:[#allocation2 + $0xb1c] ss:$20 sps:$4 sm:$0xff]  }
  0x82   :  { %v78_v25 = vld [vmem:[%s5327_s0 + $0x30] sm:$0xff] }
  0x83   :  { %2782 = vmatpush1.bf16.msra.mxu0 %v4546_v26  ;;  %v88_v26 = vld [vmem:[%s5327_s0 + $0x80] sm:$0xff] }
  0x84   :  { %2825 = vmatpush1.bf16.msra.mxu1 %v4549_v27  ;;  %2783 = vmatprep.subr.bf16.mxu0 %v4554_v28  ;;  %v4629_v27 = vld [vmem:[#allocation2 + $0x124] ss:$20 sps:$4 sm:$0xff]   ;;  %v5236_v28 = vpack.c.bf16 %v86_v23, %v76_v22 }
  0x85   :  { %2826 = vmatprep.subr.bf16.mxu1 %v4557_v29  ;;  %v4624_v29 = vld [vmem:[#allocation2 + $0xb18] ss:$20 sps:$4 sm:$0xff]  }
  0x86   :  { %v4701_v22 = vld [vmem:[#allocation2 + $0x1c4] ss:$20 sps:$4 sm:$0xff]  }
  0x87   :  { %2784 = vmatpush1.bf16.msra.mxu0 %v4552_v30  ;;  %v4627_v30 = vld [vmem:[#allocation2 + $0x120] ss:$20 sps:$4 sm:$0xff]   ;;  %v4696_v23 = vld [vmem:[#allocation2 + $0xbb8] ss:$20 sps:$4 sm:$0xff]  }
  0x88   :  { %2827 = vmatpush1.bf16.msra.mxu1 %v4555_v31  ;;  %2785 = vmatprep.subr.bf16.mxu0 %v4560_v32  ;;  %v5238_v31 = vpack.c.bf16 %v88_v26, %v78_v25  ;;  %v4632_v32 = vld [vmem:[#allocation2 + $0xaf4] ss:$20 sps:$4 sm:$0xff]   ;;  %v4707_v26 = vld [vmem:[#allocation2 + $0x19c] ss:$20 sps:$4 sm:$0xff]  }
  0x89   :  { %2828 = vmatprep.subr.bf16.mxu1 %v4563_v33  ;;  %v4635_v33 = vld [vmem:[#allocation2 + $0xfc] ss:$20 sps:$4 sm:$0xff]   ;;  %v4704_v25 = vld [vmem:[#allocation2 + $0xb94] ss:$20 sps:$4 sm:$0xff]  }
  0x8b   :  { %2786 = vmatpush1.bf16.msra.mxu0 %v4558_v34  ;;  %v4630_v34 = vld [vmem:[#allocation2 + $0xaf0] ss:$20 sps:$4 sm:$0xff]  }
  0x8c   :  { %2829 = vmatpush1.bf16.msra.mxu1 %v4561_v35  ;;  %2787 = vmatprep.subr.bf16.mxu0 %v4566_v36  ;;  %v4633_v35 = vld [vmem:[#allocation2 + $0xf8] ss:$20 sps:$4 sm:$0xff]  }
  0x8d   :  { %2830 = vmatprep.subr.bf16.mxu1 %v4569_v37  ;;  %v4638_v36 = vld [vmem:[#allocation2 + $0xacc] ss:$20 sps:$4 sm:$0xff]   ;;  %v4641_v37 = vld [vmem:[#allocation2 + $0xd4] ss:$20 sps:$4 sm:$0xff]  }
  0x8f   :  { %2788 = vmatpush1.bf16.msra.mxu0 %v4564_v38  ;;  %v81_v38 = vld [vmem:[%s5327_s0 + $0x48] sm:$0xff] }
  0x90   :  { %2831 = vmatpush1.bf16.msra.mxu1 %v4567_v39  ;;  %2789 = vmatprep.subr.bf16.mxu0 %v4572_v40  ;;  %v91_v39 = vld [vmem:[%s5327_s0 + $0x98] sm:$0xff] }
  0x91   :  { %2832 = vmatprep.subr.bf16.mxu1 %v4575_v43  ;;  %v5248_v40 = vpack.c.bf16 %v91_v39, %v81_v38  ;;  %v4644_v43 = vld [vmem:[#allocation2 + $0xaa4] ss:$20 sps:$4 sm:$0xff]   ;;  %v4717_v38 = vld [vmem:[#allocation2 + $0x148] ss:$20 sps:$4 sm:$0xff]  }
  0x92   :  { %v80_v39 = vld [vmem:[%s5327_s0 + $0x40] sm:$0xff] }
  0x93   :  { %2790 = vmatpush1.bf16.msra.mxu0 %v4570_v48  ;;  %v4645_v48 = vld [vmem:[#allocation2 + $0xa8] ss:$20 sps:$4 sm:$0xff]  }
  0x94   :  { %2833 = vmatpush1.bf16.msra.mxu1 %v4573_v49  ;;  %2791 = vmatprep.subr.bf16.mxu0 %v4578_v51  ;;  %v4650_v49 = vld [vmem:[#allocation2 + $0xa7c] ss:$20 sps:$4 sm:$0xff]   ;;  %v4653_v51 = vld [vmem:[#allocation2 + $0x84] ss:$20 sps:$4 sm:$0xff]  }
  0x95   :  { %2834 = vmatprep.subr.bf16.mxu1 %v4581_v52  ;;  %v4648_v52 = vld [vmem:[#allocation2 + $0xa78] ss:$20 sps:$4 sm:$0xff]  }
  0x97   :  { %2792 = vmatpush2.bf16.msra.mxu0 %v4576_v53  ;;  %v4651_v53 = vld [vmem:[#allocation2 + $0x80] ss:$20 sps:$4 sm:$0xff]  }
  0x98   :  { %2835 = vmatpush2.bf16.msra.mxu1 %v4579_v54  ;;  %2793 = vmatprep.subr.bf16.mxu0 %v4584_v56  ;;  %v4656_v54 = vld [vmem:[#allocation2 + $0xa54] ss:$20 sps:$4 sm:$0xff]   ;;  %v4659_v56 = vld [vmem:[#allocation2 + $0x5c] ss:$20 sps:$4 sm:$0xff]  }
  0x99   :  { %2836 = vmatprep.subr.bf16.mxu1 %v4587_v57  ;;  %v4654_v57 = vld [vmem:[#allocation2 + $0xa50] ss:$20 sps:$4 sm:$0xff]  }
  0x9b   :  { %2794 = vmatpush2.bf16.msra.mxu0 %v4582_v58  ;;  %v4657_v58 = vld [vmem:[#allocation2 + $0x58] ss:$20 sps:$4 sm:$0xff]  }
  0x9c   :  { %2837 = vmatpush2.bf16.msra.mxu1 %v4585_v59  ;;  %2795 = vmatprep.subr.bf16.mxu0 %v4590_v60  ;;  %v4662_v59 = vld [vmem:[#allocation2 + $0xa2c] ss:$20 sps:$4 sm:$0xff]   ;;  %v4665_v60 = vld [vmem:[#allocation2 + $0x34] ss:$20 sps:$4 sm:$0xff]  }
  0x9d   :  { %2838 = vmatprep.subr.bf16.mxu1 %v4593_v61  ;;  %v4660_v61 = vld [vmem:[#allocation2 + $0xa28] ss:$20 sps:$4 sm:$0xff]  }
  0x9f   :  { %2796 = vmatpush2.bf16.msra.mxu0 %v4588_v62  ;;  %v4663_v62 = vld [vmem:[#allocation2 + $0x30] ss:$20 sps:$4 sm:$0xff]  }
  0xa0   :  { %2839 = vmatpush2.bf16.msra.mxu1 %v4591_v63  ;;  %2797 = vmatprep.subr.bf16.mxu0 %v4596_v0  ;;  %v4668_v63 = vld [vmem:[#allocation2 + $0xa04] ss:$20 sps:$4 sm:$0xff]   ;;  %v4671_v0 = vld [vmem:[#allocation2 + $0xc] ss:$20 sps:$4 sm:$0xff]  }
  0xa1   :  { %2840 = vmatprep.subr.bf16.mxu1 %v4599_v1  ;;  %v4666_v1 = vld [vmem:[#allocation2 + $0xa00] ss:$20 sps:$4 sm:$0xff]  }
  0xa3   :  { %2798 = vmatpush2.bf16.msra.mxu0 %v4594_v2  ;;  %v4669_v2 = vld [vmem:[#allocation2 + $0x8] ss:$20 sps:$4 sm:$0xff]  }
  0xa4   :  { %2841 = vmatpush2.bf16.msra.mxu1 %v4597_v3  ;;  %2799 = vmatprep.subr.bf16.mxu0 %v4602_v4  ;;  %v4674_v3 = vld [vmem:[#allocation2 + $0xc5c] ss:$20 sps:$4 sm:$0xff]   ;;  %v4677_v4 = vld [vmem:[#allocation2 + $0x264] ss:$20 sps:$4 sm:$0xff]  }
  0xa5   :  { %2842 = vmatprep.subr.bf16.mxu1 %v4605_v5  ;;  %v4672_v5 = vld [vmem:[#allocation2 + $0xc58] ss:$20 sps:$4 sm:$0xff]  }
  0xa7   :  { %2800 = vmatpush2.bf16.msra.mxu0 %v4600_v6  ;;  %v4675_v6 = vld [vmem:[#allocation2 + $0x260] ss:$20 sps:$4 sm:$0xff]  }
  0xa8   :  { %2843 = vmatpush2.bf16.msra.mxu1 %v4603_v7  ;;  %2801 = vmatprep.subr.bf16.mxu0 %v4608_v8  ;;  %v4680_v7 = vld [vmem:[#allocation2 + $0xc34] ss:$20 sps:$4 sm:$0xff]   ;;  %v4683_v8 = vld [vmem:[#allocation2 + $0x23c] ss:$20 sps:$4 sm:$0xff]  }
  0xa9   :  { %2844 = vmatprep.subr.bf16.mxu1 %v4611_v9  ;;  %v4678_v9 = vld [vmem:[#allocation2 + $0xc30] ss:$20 sps:$4 sm:$0xff]  }
  0xab   :  { %2802 = vmatpush2.bf16.msra.mxu0 %v4606_v10  ;;  %v4681_v10 = vld [vmem:[#allocation2 + $0x238] ss:$20 sps:$4 sm:$0xff]  }
  0xac   :  { %2845 = vmatpush2.bf16.msra.mxu1 %v4609_v11  ;;  %2803 = vmatprep.subr.bf16.mxu0 %v4614_v13  ;;  %v4686_v11 = vld [vmem:[#allocation2 + $0xc0c] ss:$20 sps:$4 sm:$0xff]   ;;  %v4689_v13 = vld [vmem:[#allocation2 + $0x214] ss:$20 sps:$4 sm:$0xff]  }
  0xad   :  { %2846 = vmatprep.subr.bf16.mxu1 %v4617_v14  ;;  %v4684_v14 = vld [vmem:[#allocation2 + $0xc08] ss:$20 sps:$4 sm:$0xff]  }
  0xaf   :  { %2804 = vmatpush2.bf16.msra.mxu0 %v4612_v16  ;;  %v4687_v16 = vld [vmem:[#allocation2 + $0x210] ss:$20 sps:$4 sm:$0xff]  }
  0xb0   :  { %2847 = vmatpush2.bf16.msra.mxu1 %v4615_v17  ;;  %2805 = vmatprep.subr.bf16.mxu0 %v4620_v18  ;;  %v4692_v17 = vld [vmem:[#allocation2 + $0xbe4] ss:$20 sps:$4 sm:$0xff]   ;;  %v4695_v18 = vld [vmem:[#allocation2 + $0x1ec] ss:$20 sps:$4 sm:$0xff]  }
  0xb1   :  { %2848 = vmatprep.subr.bf16.mxu1 %v4623_v19  ;;  %v4690_v19 = vld [vmem:[#allocation2 + $0xbe0] ss:$20 sps:$4 sm:$0xff]  }
  0xb3   :  { %2806 = vmatpush2.bf16.msra.mxu0 %v4618_v20  ;;  %v4693_v20 = vld [vmem:[#allocation2 + $0x1e8] ss:$20 sps:$4 sm:$0xff]  }
  0xb4   :  { %2849 = vmatpush2.bf16.msra.mxu1 %v4621_v21  ;;  %2861 = vmatprep.subr.bf16.mxu0 %v4626_v24  ;;  %v4698_v21 = vld [vmem:[#allocation2 + $0xbbc] ss:$20 sps:$4 sm:$0xff]   ;;  %v4699_v24 = vld [vmem:[#allocation2 + $0x1c0] ss:$20 sps:$4 sm:$0xff]  }
  0xb5   :  { %2904 = vmatprep.subr.bf16.mxu1 %v4629_v27  ;;  %v4702_v27 = vld [vmem:[#allocation2 + $0xb90] ss:$20 sps:$4 sm:$0xff]  }
  0xb6   :  { %2808 = vmatmul.mubr.bf16.vlgmr.msra.gmra.mxu0 %v5236_v28 }
  0xb7   :  { %2851 = vmatmul.mubr.bf16.vlgmr.msra.gmra.mxu1 %v5238_v31  ;;  %2862 = vmatpush1.bf16.msra.mxu0 %v4624_v29  ;;  %v4705_v29 = vld [vmem:[#allocation2 + $0x198] ss:$20 sps:$4 sm:$0xff]  }
  0xb8   :  { %2905 = vmatpush1.bf16.msra.mxu1 %v4627_v30  ;;  %2863 = vmatprep.subr.bf16.mxu0 %v4632_v32  ;;  %v4710_v30 = vld [vmem:[#allocation2 + $0xb6c] ss:$20 sps:$4 sm:$0xff]   ;;  %v4713_v32 = vld [vmem:[#allocation2 + $0x174] ss:$20 sps:$4 sm:$0xff]  }
  0xb9   :  { %2906 = vmatprep.subr.bf16.mxu1 %v4635_v33  ;;  %2936 = vmatprep.mubr.bf16.mxu1 %v5176_v50  ;;  %v4708_v33 = vld [vmem:[#allocation2 + $0xb68] ss:$20 sps:$4 sm:$0xff]  }
  0xba   :  { %2893 = vmatprep.mubr.bf16.mxu0 %v5248_v40 }
  0xbb   :  { %2864 = vmatpush1.bf16.msra.mxu0 %v4630_v34  ;;  %v4711_v34 = vld [vmem:[#allocation2 + $0x170] ss:$20 sps:$4 sm:$0xff]  }
  0xbc   :  { %2907 = vmatpush1.bf16.msra.mxu1 %v4633_v35  ;;  %2865 = vmatprep.subr.bf16.mxu0 %v4638_v36  ;;  %v4716_v35 = vld [vmem:[#allocation2 + $0xb44] ss:$20 sps:$4 sm:$0xff]   ;;  %v4719_v36 = vld [vmem:[#allocation2 + $0x14c] ss:$20 sps:$4 sm:$0xff]  }
  0xbd   :  { %2908 = vmatprep.subr.bf16.mxu1 %v4641_v37  ;;  %v4714_v37 = vld [vmem:[#allocation2 + $0xb40] ss:$20 sps:$4 sm:$0xff]  }
  0xbf   :  { %2866 = vmatpush1.bf16.msra.mxu0 %v4636_v41  ;;  %v90_v41 = vld [vmem:[%s5327_s0 + $0x90] sm:$0xff] }
  0xc0   :  { %2909 = vmatpush1.bf16.msra.mxu1 %v4639_v42  ;;  %2867 = vmatprep.subr.bf16.mxu0 %v4644_v43  ;;  %v4722_v42 = vld [vmem:[#allocation2 + $0x3a4] ss:$20 sps:$4 sm:$0xff]  }
  0xc1   :  { %2910 = vmatprep.subr.bf16.mxu1 %v4647_v45  ;;  %v4725_v43 = vld [vmem:[#allocation2 + $0x624] ss:$20 sps:$4 sm:$0xff]   ;;  %v5258_v45 = vpack.c.bf16 %v90_v41, %v80_v39  ;;  %v4800_v39 = vld [vmem:[#allocation2 + $0x41c] ss:$20 sps:$4 sm:$0xff]  }
  0xc2   :  { %v4803_v41 = vld [vmem:[#allocation2 + $0x69c] ss:$20 sps:$4 sm:$0xff]  }
  0xc3   :  { %2868 = vmatpush1.bf16.msra.mxu0 %v4642_v46  ;;  %v4720_v46 = vld [vmem:[#allocation2 + $0x3a0] ss:$20 sps:$4 sm:$0xff]  }
  0xc4   :  { %2911 = vmatpush1.bf16.msra.mxu1 %v4645_v48  ;;  %2869 = vmatprep.subr.bf16.mxu0 %v4650_v49  ;;  %v4723_v48 = vld [vmem:[#allocation2 + $0x620] ss:$20 sps:$4 sm:$0xff]   ;;  %v4728_v49 = vld [vmem:[#allocation2 + $0x37c] ss:$20 sps:$4 sm:$0xff]  }
  0xc5   :  { %2912 = vmatprep.subr.bf16.mxu1 %v4653_v51  ;;  %v4731_v51 = vld [vmem:[#allocation2 + $0x5fc] ss:$20 sps:$4 sm:$0xff]  }
  0xc7   :  { %2870 = vmatpush1.bf16.msra.mxu0 %v4648_v52  ;;  %v4726_v52 = vld [vmem:[#allocation2 + $0x378] ss:$20 sps:$4 sm:$0xff]  }
  0xc8   :  { %2913 = vmatpush1.bf16.msra.mxu1 %v4651_v53  ;;  %2871 = vmatprep.subr.bf16.mxu0 %v4656_v54  ;;  %v4729_v53 = vld [vmem:[#allocation2 + $0x5f8] ss:$20 sps:$4 sm:$0xff]   ;;  %v4734_v54 = vld [vmem:[#allocation2 + $0x354] ss:$20 sps:$4 sm:$0xff]  }
  0xc9   :  { %2914 = vmatprep.subr.bf16.mxu1 %v4659_v56  ;;  %v4737_v56 = vld [vmem:[#allocation2 + $0x5d4] ss:$20 sps:$4 sm:$0xff]  }
  0xcb   :  { %2872 = vmatpush1.bf16.msra.mxu0 %v4654_v57  ;;  %v4732_v57 = vld [vmem:[#allocation2 + $0x350] ss:$20 sps:$4 sm:$0xff]  }
  0xcc   :  { %2915 = vmatpush1.bf16.msra.mxu1 %v4657_v58  ;;  %2873 = vmatprep.subr.bf16.mxu0 %v4662_v59  ;;  %v4735_v58 = vld [vmem:[#allocation2 + $0x5d0] ss:$20 sps:$4 sm:$0xff]   ;;  %v4740_v59 = vld [vmem:[#allocation2 + $0x32c] ss:$20 sps:$4 sm:$0xff]  }
  0xcd   :  { %2916 = vmatprep.subr.bf16.mxu1 %v4665_v60  ;;  %v4743_v60 = vld [vmem:[#allocation2 + $0x5ac] ss:$20 sps:$4 sm:$0xff]  }
  0xcf   :  { %2874 = vmatpush1.bf16.msra.mxu0 %v4660_v61  ;;  %v4738_v61 = vld [vmem:[#allocation2 + $0x328] ss:$20 sps:$4 sm:$0xff]  }
  0xd0   :  { %2917 = vmatpush1.bf16.msra.mxu1 %v4663_v62  ;;  %2875 = vmatprep.subr.bf16.mxu0 %v4668_v63  ;;  %v4741_v62 = vld [vmem:[#allocation2 + $0x5a8] ss:$20 sps:$4 sm:$0xff]   ;;  %v4746_v63 = vld [vmem:[#allocation2 + $0x304] ss:$20 sps:$4 sm:$0xff]  }
  0xd1   :  { %2918 = vmatprep.subr.bf16.mxu1 %v4671_v0  ;;  %v4749_v0 = vld [vmem:[#allocation2 + $0x584] ss:$20 sps:$4 sm:$0xff]  }
  0xd3   :  { %2876 = vmatpush1.bf16.msra.mxu0 %v4666_v1  ;;  %v4744_v1 = vld [vmem:[#allocation2 + $0x300] ss:$20 sps:$4 sm:$0xff]  }
  0xd4   :  { %2919 = vmatpush1.bf16.msra.mxu1 %v4669_v2  ;;  %2877 = vmatprep.subr.bf16.mxu0 %v4674_v3  ;;  %v4747_v2 = vld [vmem:[#allocation2 + $0x580] ss:$20 sps:$4 sm:$0xff]   ;;  %v4752_v3 = vld [vmem:[#allocation2 + $0x2dc] ss:$20 sps:$4 sm:$0xff]  }
  0xd5   :  { %2920 = vmatprep.subr.bf16.mxu1 %v4677_v4  ;;  %v4755_v4 = vld [vmem:[#allocation2 + $0x55c] ss:$20 sps:$4 sm:$0xff]  }
  0xd7   :  { %2878 = vmatpush2.bf16.msra.mxu0 %v4672_v5  ;;  %v4750_v5 = vld [vmem:[#allocation2 + $0x2d8] ss:$20 sps:$4 sm:$0xff]  }
  0xd8   :  { %2921 = vmatpush2.bf16.msra.mxu1 %v4675_v6  ;;  %2879 = vmatprep.subr.bf16.mxu0 %v4680_v7  ;;  %v4753_v6 = vld [vmem:[#allocation2 + $0x558] ss:$20 sps:$4 sm:$0xff]   ;;  %v4758_v7 = vld [vmem:[#allocation2 + $0x2b4] ss:$20 sps:$4 sm:$0xff]  }
  0xd9   :  { %2922 = vmatprep.subr.bf16.mxu1 %v4683_v8  ;;  %v4761_v8 = vld [vmem:[#allocation2 + $0x534] ss:$20 sps:$4 sm:$0xff]  }
  0xdb   :  { %2880 = vmatpush2.bf16.msra.mxu0 %v4678_v9  ;;  %v4756_v9 = vld [vmem:[#allocation2 + $0x2b0] ss:$20 sps:$4 sm:$0xff]  }
  0xdc   :  { %2923 = vmatpush2.bf16.msra.mxu1 %v4681_v10  ;;  %2881 = vmatprep.subr.bf16.mxu0 %v4686_v11  ;;  %v4759_v10 = vld [vmem:[#allocation2 + $0x530] ss:$20 sps:$4 sm:$0xff]   ;;  %v4764_v11 = vld [vmem:[#allocation2 + $0x28c] ss:$20 sps:$4 sm:$0xff]  }
  0xdd   :  { %2924 = vmatprep.subr.bf16.mxu1 %v4689_v13  ;;  %v4767_v13 = vld [vmem:[#allocation2 + $0x50c] ss:$20 sps:$4 sm:$0xff]  }
  0xdf   :  { %2882 = vmatpush2.bf16.msra.mxu0 %v4684_v14  ;;  %v4762_v14 = vld [vmem:[#allocation2 + $0x288] ss:$20 sps:$4 sm:$0xff]  }
  0xe0   :  { %2925 = vmatpush2.bf16.msra.mxu1 %v4687_v16  ;;  %2883 = vmatprep.subr.bf16.mxu0 %v4692_v17  ;;  %v4765_v16 = vld [vmem:[#allocation2 + $0x508] ss:$20 sps:$4 sm:$0xff]   ;;  %v4770_v17 = vld [vmem:[#allocation2 + $0x4e4] ss:$20 sps:$4 sm:$0xff]  }
  0xe1   :  { %2926 = vmatprep.subr.bf16.mxu1 %v4695_v18  ;;  %v4773_v18 = vld [vmem:[#allocation2 + $0x764] ss:$20 sps:$4 sm:$0xff]  }
  0xe3   :  { %2884 = vmatpush2.bf16.msra.mxu0 %v4690_v19  ;;  %v4768_v19 = vld [vmem:[#allocation2 + $0x4e0] ss:$20 sps:$4 sm:$0xff]  }
  0xe4   :  { %2927 = vmatpush2.bf16.msra.mxu1 %v4693_v20  ;;  %2885 = vmatprep.subr.bf16.mxu0 %v4698_v21  ;;  %v4771_v20 = vld [vmem:[#allocation2 + $0x760] ss:$20 sps:$4 sm:$0xff]   ;;  %v4776_v21 = vld [vmem:[#allocation2 + $0x4bc] ss:$20 sps:$4 sm:$0xff]  }
  0xe5   :  { %2928 = vmatprep.subr.bf16.mxu1 %v4701_v22  ;;  %v4779_v22 = vld [vmem:[#allocation2 + $0x73c] ss:$20 sps:$4 sm:$0xff]  }
  0xe7   :  { %2886 = vmatpush2.bf16.msra.mxu0 %v4696_v23  ;;  %v4774_v23 = vld [vmem:[#allocation2 + $0x4b8] ss:$20 sps:$4 sm:$0xff]  }
  0xe8   :  { %2929 = vmatpush2.bf16.msra.mxu1 %v4699_v24  ;;  %2887 = vmatprep.subr.bf16.mxu0 %v4704_v25  ;;  %v4777_v24 = vld [vmem:[#allocation2 + $0x738] ss:$20 sps:$4 sm:$0xff]   ;;  %v4782_v25 = vld [vmem:[#allocation2 + $0x494] ss:$20 sps:$4 sm:$0xff]  }
  0xe9   :  { %2930 = vmatprep.subr.bf16.mxu1 %v4707_v26  ;;  %v4785_v26 = vld [vmem:[#allocation2 + $0x714] ss:$20 sps:$4 sm:$0xff]  }
  0xeb   :  { %2888 = vmatpush2.bf16.msra.mxu0 %v4702_v27  ;;  %v4780_v27 = vld [vmem:[#allocation2 + $0x490] ss:$20 sps:$4 sm:$0xff]  }
  0xec   :  { %2931 = vmatpush2.bf16.msra.mxu1 %v4705_v29  ;;  %2889 = vmatprep.subr.bf16.mxu0 %v4710_v30  ;;  %v4783_v29 = vld [vmem:[#allocation2 + $0x710] ss:$20 sps:$4 sm:$0xff]   ;;  %v4788_v30 = vld [vmem:[#allocation2 + $0x46c] ss:$20 sps:$4 sm:$0xff]  }
  0xed   :  { %2932 = vmatprep.subr.bf16.mxu1 %v4713_v32  ;;  %v4791_v32 = vld [vmem:[#allocation2 + $0x6ec] ss:$20 sps:$4 sm:$0xff]  }
  0xef   :  { %2890 = vmatpush2.bf16.msra.mxu0 %v4708_v33  ;;  %v4786_v33 = vld [vmem:[#allocation2 + $0x468] ss:$20 sps:$4 sm:$0xff]  }
  0xf0   :  { %2933 = vmatpush2.bf16.msra.mxu1 %v4711_v34  ;;  %2891 = vmatprep.subr.bf16.mxu0 %v4716_v35  ;;  %v4789_v34 = vld [vmem:[#allocation2 + $0x6e8] ss:$20 sps:$4 sm:$0xff]   ;;  %v4794_v35 = vld [vmem:[#allocation2 + $0x444] ss:$20 sps:$4 sm:$0xff]  }
  0xf1   :  { %2934 = vmatprep.subr.bf16.mxu1 %v4719_v36  ;;  %v4797_v36 = vld [vmem:[#allocation2 + $0x6c4] ss:$20 sps:$4 sm:$0xff]  }
  0xf3   :  { %2892 = vmatpush2.bf16.msra.mxu0 %v4714_v37  ;;  %v4792_v37 = vld [vmem:[#allocation2 + $0x440] ss:$20 sps:$4 sm:$0xff]  }
  0xf4   :  { %2935 = vmatpush2.bf16.msra.mxu1 %v4717_v38  ;;  %2947 = vmatprep.subr.bf16.mxu0 %v4722_v42  ;;  %v4795_v38 = vld [vmem:[#allocation2 + $0x6c0] ss:$20 sps:$4 sm:$0xff]   ;;  %v4798_v42 = vld [vmem:[#allocation2 + $0x418] ss:$20 sps:$4 sm:$0xff]  }
  0xf5   :  { %2990 = vmatprep.subr.bf16.mxu1 %v4725_v43  ;;  %v4801_v43 = vld [vmem:[#allocation2 + $0x698] ss:$20 sps:$4 sm:$0xff]  }
  0xf6   :  { %2894 = vmatmul.mubr.bf16.vlgmr.msra.gmra.mxu0 %v5258_v45 }
  0xf7   :  { %2937 = vmatmul.mubr.bf16.vlgmr.msra.gmra.mxu1 %v5200_v12  ;;  %2948 = vmatpush1.bf16.msra.mxu0 %v4720_v46  ;;  %v4806_v46 = vld [vmem:[#allocation2 + $0x3f4] ss:$20 sps:$4 sm:$0xff]  }
  0xf8   :  { %2991 = vmatpush1.bf16.msra.mxu1 %v4723_v48  ;;  %2949 = vmatprep.subr.bf16.mxu0 %v4728_v49  ;;  %v4809_v48 = vld [vmem:[#allocation2 + $0x674] ss:$20 sps:$4 sm:$0xff]   ;;  %v4804_v49 = vld [vmem:[#allocation2 + $0x3f0] ss:$20 sps:$4 sm:$0xff]  }
  0xf9   :  { %2992 = vmatprep.subr.bf16.mxu1 %v4731_v51  ;;  %2979 = vmatprep.mubr.bf16.mxu0 %v5184_v55  ;;  %v4807_v51 = vld [vmem:[#allocation2 + $0x670] ss:$20 sps:$4 sm:$0xff]  }
  0xfa   :  { %3022 = vmatprep.mubr.bf16.mxu1 %v5212_v44 }
  0xfb   :  { %2950 = vmatpush1.bf16.msra.mxu0 %v4726_v52  ;;  %v4812_v52 = vld [vmem:[#allocation2 + $0x3cc] ss:$20 sps:$4 sm:$0xff]  }
  0xfc   :  { %2993 = vmatpush1.bf16.msra.mxu1 %v4729_v53  ;;  %2951 = vmatprep.subr.bf16.mxu0 %v4734_v54  ;;  %v4815_v53 = vld [vmem:[#allocation2 + $0x64c] ss:$20 sps:$4 sm:$0xff]   ;;  %v4810_v54 = vld [vmem:[#allocation2 + $0x3c8] ss:$20 sps:$4 sm:$0xff]  }
  0xfd   :  { %2994 = vmatprep.subr.bf16.mxu1 %v4737_v56  ;;  %v4813_v56 = vld [vmem:[#allocation2 + $0x648] ss:$20 sps:$4 sm:$0xff]  }
  0xff   :  { %2952 = vmatpush1.bf16.msra.mxu0 %v4732_v57  ;;  %v4818_v57 = vld [vmem:[#allocation2 + $0x8a4] ss:$20 sps:$4 sm:$0xff]  }
 0x100   :  { %2995 = vmatpush1.bf16.msra.mxu1 %v4735_v58  ;;  %2953 = vmatprep.subr.bf16.mxu0 %v4740_v59  ;;  %v4821_v58 = vld [vmem:[#allocation2 + $0xb24] ss:$20 sps:$4 sm:$0xff]   ;;  %v4816_v59 = vld [vmem:[#allocation2 + $0x8a0] ss:$20 sps:$4 sm:$0xff]  }
 0x101   :  { %2996 = vmatprep.subr.bf16.mxu1 %v4743_v60  ;;  %v4819_v60 = vld [vmem:[#allocation2 + $0xb20] ss:$20 sps:$4 sm:$0xff]  }
 0x103   :  { %2954 = vmatpush1.bf16.msra.mxu0 %v4738_v61  ;;  %v4824_v61 = vld [vmem:[#allocation2 + $0x87c] ss:$20 sps:$4 sm:$0xff]  }
 0x104   :  { %2997 = vmatpush1.bf16.msra.mxu1 %v4741_v62  ;;  %2955 = vmatprep.subr.bf16.mxu0 %v4746_v63  ;;  %v4827_v62 = vld [vmem:[#allocation2 + $0xafc] ss:$20 sps:$4 sm:$0xff]   ;;  %v4822_v63 = vld [vmem:[#allocation2 + $0x878] ss:$20 sps:$4 sm:$0xff]  }
 0x105   :  { %2998 = vmatprep.subr.bf16.mxu1 %v4749_v0  ;;  %v4825_v0 = vld [vmem:[#allocation2 + $0xaf8] ss:$20 sps:$4 sm:$0xff]  }
 0x107   :  { %2956 = vmatpush1.bf16.msra.mxu0 %v4744_v1  ;;  %v4830_v1 = vld [vmem:[#allocation2 + $0x854] ss:$20 sps:$4 sm:$0xff]  }
 0x108   :  { %2999 = vmatpush1.bf16.msra.mxu1 %v4747_v2  ;;  %2957 = vmatprep.subr.bf16.mxu0 %v4752_v3  ;;  %v4833_v2 = vld [vmem:[#allocation2 + $0xad4] ss:$20 sps:$4 sm:$0xff]   ;;  %v4828_v3 = vld [vmem:[#allocation2 + $0x850] ss:$20 sps:$4 sm:$0xff]  }
 0x109   :  { %3000 = vmatprep.subr.bf16.mxu1 %v4755_v4  ;;  %v4831_v4 = vld [vmem:[#allocation2 + $0xad0] ss:$20 sps:$4 sm:$0xff]  }
 0x10b   :  { %2958 = vmatpush1.bf16.msra.mxu0 %v4750_v5  ;;  %v4836_v5 = vld [vmem:[#allocation2 + $0x82c] ss:$20 sps:$4 sm:$0xff]  }
 0x10c   :  { %3001 = vmatpush1.bf16.msra.mxu1 %v4753_v6  ;;  %2959 = vmatprep.subr.bf16.mxu0 %v4758_v7  ;;  %v4839_v6 = vld [vmem:[#allocation2 + $0xaac] ss:$20 sps:$4 sm:$0xff]   ;;  %v4834_v7 = vld [vmem:[#allocation2 + $0x828] ss:$20 sps:$4 sm:$0xff]  }
 0x10d   :  { %3002 = vmatprep.subr.bf16.mxu1 %v4761_v8  ;;  %v4837_v8 = vld [vmem:[#allocation2 + $0xaa8] ss:$20 sps:$4 sm:$0xff]  }
 0x10f   :  { %2960 = vmatpush1.bf16.msra.mxu0 %v4756_v9  ;;  %v4842_v9 = vld [vmem:[#allocation2 + $0x804] ss:$20 sps:$4 sm:$0xff]  }
 0x110   :  { %3003 = vmatpush1.bf16.msra.mxu1 %v4759_v10  ;;  %2961 = vmatprep.subr.bf16.mxu0 %v4764_v11  ;;  %v4845_v10 = vld [vmem:[#allocation2 + $0xa84] ss:$20 sps:$4 sm:$0xff]   ;;  %v4840_v11 = vld [vmem:[#allocation2 + $0x800] ss:$20 sps:$4 sm:$0xff]  }
 0x111   :  { %3004 = vmatprep.subr.bf16.mxu1 %v4767_v13  ;;  %v4843_v13 = vld [vmem:[#allocation2 + $0xa80] ss:$20 sps:$4 sm:$0xff]  }
 0x113   :  { %2962 = vmatpush1.bf16.msra.mxu0 %v4762_v14  ;;  %v4848_v14 = vld [vmem:[#allocation2 + $0x7dc] ss:$20 sps:$4 sm:$0xff]  }
 0x114   :  { %3005 = vmatpush1.bf16.msra.mxu1 %v4765_v16  ;;  %2963 = vmatprep.subr.bf16.mxu0 %v4770_v17  ;;  %v4851_v16 = vld [vmem:[#allocation2 + $0xa5c] ss:$20 sps:$4 sm:$0xff]   ;;  %v4846_v17 = vld [vmem:[#allocation2 + $0x7d8] ss:$20 sps:$4 sm:$0xff]  }
 0x115   :  { %3006 = vmatprep.subr.bf16.mxu1 %v4773_v18  ;;  %v4849_v18 = vld [vmem:[#allocation2 + $0xa58] ss:$20 sps:$4 sm:$0xff]  }
 0x117   :  { %2964 = vmatpush2.bf16.msra.mxu0 %v4768_v19  ;;  %v4854_v19 = vld [vmem:[#allocation2 + $0x7b4] ss:$20 sps:$4 sm:$0xff]  }
 0x118   :  { %3007 = vmatpush2.bf16.msra.mxu1 %v4771_v20  ;;  %2965 = vmatprep.subr.bf16.mxu0 %v4776_v21  ;;  %v4857_v20 = vld [vmem:[#allocation2 + $0xa34] ss:$20 sps:$4 sm:$0xff]   ;;  %v4852_v21 = vld [vmem:[#allocation2 + $0x7b0] ss:$20 sps:$4 sm:$0xff]  }
 0x119   :  { %3008 = vmatprep.subr.bf16.mxu1 %v4779_v22  ;;  %v4855_v22 = vld [vmem:[#allocation2 + $0xa30] ss:$20 sps:$4 sm:$0xff]  }
 0x11b   :  { %2966 = vmatpush2.bf16.msra.mxu0 %v4774_v23  ;;  %v4860_v23 = vld [vmem:[#allocation2 + $0x78c] ss:$20 sps:$4 sm:$0xff]  }
 0x11c   :  { %3009 = vmatpush2.bf16.msra.mxu1 %v4777_v24  ;;  %2967 = vmatprep.subr.bf16.mxu0 %v4782_v25  ;;  %v4863_v24 = vld [vmem:[#allocation2 + $0xa0c] ss:$20 sps:$4 sm:$0xff]   ;;  %v4858_v25 = vld [vmem:[#allocation2 + $0x788] ss:$20 sps:$4 sm:$0xff]  }
 0x11d   :  { %3010 = vmatprep.subr.bf16.mxu1 %v4785_v26  ;;  %v4861_v26 = vld [vmem:[#allocation2 + $0xa08] ss:$20 sps:$4 sm:$0xff]  }
 0x11f   :  { %2968 = vmatpush2.bf16.msra.mxu0 %v4780_v27  ;;  %v4866_v27 = vld [vmem:[#allocation2 + $0x9e4] ss:$20 sps:$4 sm:$0xff]  }
 0x120   :  { %3011 = vmatpush2.bf16.msra.mxu1 %v4783_v29  ;;  %2969 = vmatprep.subr.bf16.mxu0 %v4788_v30  ;;  %v4869_v29 = vld [vmem:[#allocation2 + $0xc64] ss:$20 sps:$4 sm:$0xff]   ;;  %v4864_v30 = vld [vmem:[#allocation2 + $0x9e0] ss:$20 sps:$4 sm:$0xff]  }
 0x121   :  { %3012 = vmatprep.subr.bf16.mxu1 %v4791_v32  ;;  %v4867_v32 = vld [vmem:[#allocation2 + $0xc60] ss:$20 sps:$4 sm:$0xff]  }
 0x123   :  { %2970 = vmatpush2.bf16.msra.mxu0 %v4786_v33  ;;  %v4872_v33 = vld [vmem:[#allocation2 + $0x9bc] ss:$20 sps:$4 sm:$0xff]  }
 0x124   :  { %3013 = vmatpush2.bf16.msra.mxu1 %v4789_v34  ;;  %2971 = vmatprep.subr.bf16.mxu0 %v4794_v35  ;;  %v4875_v34 = vld [vmem:[#allocation2 + $0xc3c] ss:$20 sps:$4 sm:$0xff]   ;;  %v4870_v35 = vld [vmem:[#allocation2 + $0x9b8] ss:$20 sps:$4 sm:$0xff]  }
 0x125   :  { %3014 = vmatprep.subr.bf16.mxu1 %v4797_v36  ;;  %v4873_v36 = vld [vmem:[#allocation2 + $0xc38] ss:$20 sps:$4 sm:$0xff]  }
 0x127   :  { %2972 = vmatpush2.bf16.msra.mxu0 %v4792_v37  ;;  %v4878_v37 = vld [vmem:[#allocation2 + $0x994] ss:$20 sps:$4 sm:$0xff]  }
 0x128   :  { %3015 = vmatpush2.bf16.msra.mxu1 %v4795_v38  ;;  %2973 = vmatprep.subr.bf16.mxu0 %v4800_v39  ;;  %v4881_v38 = vld [vmem:[#allocation2 + $0xc14] ss:$20 sps:$4 sm:$0xff]   ;;  %v4876_v39 = vld [vmem:[#allocation2 + $0x990] ss:$20 sps:$4 sm:$0xff]  }
 0x129   :  { %3016 = vmatprep.subr.bf16.mxu1 %v4803_v41  ;;  %v4879_v41 = vld [vmem:[#allocation2 + $0xc10] ss:$20 sps:$4 sm:$0xff]  }
 0x12b   :  { %2974 = vmatpush2.bf16.msra.mxu0 %v4798_v42  ;;  %v4884_v42 = vld [vmem:[#allocation2 + $0x96c] ss:$20 sps:$4 sm:$0xff]  }
 0x12c   :  { %3017 = vmatpush2.bf16.msra.mxu1 %v4801_v43  ;;  %2975 = vmatprep.subr.bf16.mxu0 %v4806_v46  ;;  %v4887_v43 = vld [vmem:[#allocation2 + $0xbec] ss:$20 sps:$4 sm:$0xff]   ;;  %v4882_v46 = vld [vmem:[#allocation2 + $0x968] ss:$20 sps:$4 sm:$0xff]  }
 0x12d   :  { %3018 = vmatprep.subr.bf16.mxu1 %v4809_v48  ;;  %v4885_v48 = vld [vmem:[#allocation2 + $0xbe8] ss:$20 sps:$4 sm:$0xff]  }
 0x12f   :  { %2976 = vmatpush2.bf16.msra.mxu0 %v4804_v49  ;;  %v4890_v49 = vld [vmem:[#allocation2 + $0x944] ss:$20 sps:$4 sm:$0xff]  }
 0x130   :  { %3019 = vmatpush2.bf16.msra.mxu1 %v4807_v51  ;;  %2977 = vmatprep.subr.bf16.mxu0 %v4812_v52  ;;  %v4893_v51 = vld [vmem:[#allocation2 + $0xbc4] ss:$20 sps:$4 sm:$0xff]   ;;  %v4888_v52 = vld [vmem:[#allocation2 + $0x940] ss:$20 sps:$4 sm:$0xff]  }
 0x131   :  { %3020 = vmatprep.subr.bf16.mxu1 %v4815_v53  ;;  %v4891_v53 = vld [vmem:[#allocation2 + $0xbc0] ss:$20 sps:$4 sm:$0xff]  }
 0x133   :  { %2978 = vmatpush2.bf16.msra.mxu0 %v4810_v54  ;;  %v4896_v54 = vld [vmem:[#allocation2 + $0x91c] ss:$20 sps:$4 sm:$0xff]  }
 0x134   :  { %3021 = vmatpush2.bf16.msra.mxu1 %v4813_v56  ;;  %3033 = vmatprep.subr.bf16.mxu0 %v4818_v57  ;;  %v4899_v56 = vld [vmem:[#allocation2 + $0xb9c] ss:$20 sps:$4 sm:$0xff]   ;;  %v4894_v57 = vld [vmem:[#allocation2 + $0x918] ss:$20 sps:$4 sm:$0xff]  }
 0x135   :  { %3076 = vmatprep.subr.bf16.mxu1 %v4821_v58  ;;  %v4897_v58 = vld [vmem:[#allocation2 + $0xb98] ss:$20 sps:$4 sm:$0xff]  }
 0x136   :  { %2980 = vmatmul.mubr.bf16.vlgmr.msra.gmra.mxu0 %v5202_v15 }
 0x137   :  { %3023 = vmatmul.mubr.bf16.vlgmr.msra.gmra.mxu1 %v5236_v28  ;;  %3034 = vmatpush1.bf16.msra.mxu0 %v4816_v59  ;;  %v4902_v59 = vld [vmem:[#allocation2 + $0x8f4] ss:$20 sps:$4 sm:$0xff]  }
 0x138   :  { %3077 = vmatpush1.bf16.msra.mxu1 %v4819_v60  ;;  %3035 = vmatprep.subr.bf16.mxu0 %v4824_v61  ;;  %v4905_v60 = vld [vmem:[#allocation2 + $0xb74] ss:$20 sps:$4 sm:$0xff]   ;;  %v4900_v61 = vld [vmem:[#allocation2 + $0x8f0] ss:$20 sps:$4 sm:$0xff]  }
 0x139   :  { %3078 = vmatprep.subr.bf16.mxu1 %v4827_v62  ;;  %3065 = vmatprep.mubr.bf16.mxu0 %v5220_v47  ;;  %v4903_v62 = vld [vmem:[#allocation2 + $0xb70] ss:$20 sps:$4 sm:$0xff]  }
 0x13a   :  { %3108 = vmatprep.mubr.bf16.mxu1 %v5248_v40 }
 0x13b   :  { %3036 = vmatpush1.bf16.msra.mxu0 %v4822_v63  ;;  %v4908_v63 = vld [vmem:[#allocation2 + $0x8cc] ss:$20 sps:$4 sm:$0xff]  }
 0x13c   :  { %3079 = vmatpush1.bf16.msra.mxu1 %v4825_v0  ;;  %3037 = vmatprep.subr.bf16.mxu0 %v4830_v1  ;;  %v4911_v0 = vld [vmem:[#allocation2 + $0xb4c] ss:$20 sps:$4 sm:$0xff]   ;;  %v4906_v1 = vld [vmem:[#allocation2 + $0x8c8] ss:$20 sps:$4 sm:$0xff]  }
 0x13d   :  { %3080 = vmatprep.subr.bf16.mxu1 %v4833_v2  ;;  %v4909_v2 = vld [vmem:[#allocation2 + $0xb48] ss:$20 sps:$4 sm:$0xff]  }
 0x13f   :  { %3038 = vmatpush1.bf16.msra.mxu0 %v4828_v3  ;;  %v4912_v3 = vld [vmem:[#allocation2 + $0x268] ss:$20 sps:$4 sm:$0xff]  }
 0x140   :  { %3081 = vmatpush1.bf16.msra.mxu1 %v4831_v4  ;;  %3039 = vmatprep.subr.bf16.mxu0 %v4836_v5  ;;  %v4913_v4 = vld [vmem:[#allocation2 + $0x4e8] ss:$20 sps:$4 sm:$0xff]  }
 0x141   :  { %3082 = vmatprep.subr.bf16.mxu1 %v4839_v6  ;;  %v4914_v5 = vld [vmem:[#allocation2 + $0x128] ss:$20 sps:$4 sm:$0xff]  }
 0x142   :  { %v4915_v6 = vld [vmem:[#allocation2 + $0x3a8] ss:$20 sps:$4 sm:$0xff]  }
 0x143   :  { %3040 = vmatpush1.bf16.msra.mxu0 %v4834_v7  ;;  %v4916_v7 = vld [vmem:[#allocation2 + $0x240] ss:$20 sps:$4 sm:$0xff]  }
 0x144   :  { %3083 = vmatpush1.bf16.msra.mxu1 %v4837_v8  ;;  %3041 = vmatprep.subr.bf16.mxu0 %v4842_v9  ;;  %v4917_v8 = vld [vmem:[#allocation2 + $0x4c0] ss:$20 sps:$4 sm:$0xff]  }
 0x145   :  { %3084 = vmatprep.subr.bf16.mxu1 %v4845_v10  ;;  %v4918_v9 = vld [vmem:[#allocation2 + $0x100] ss:$20 sps:$4 sm:$0xff]  }
 0x146   :  { %v4919_v10 = vld [vmem:[#allocation2 + $0x380] ss:$20 sps:$4 sm:$0xff]  }
 0x147   :  { %3042 = vmatpush1.bf16.msra.mxu0 %v4840_v11  ;;  %v4920_v11 = vld [vmem:[#allocation2 + $0x218] ss:$20 sps:$4 sm:$0xff]  }
 0x148   :  { %3085 = vmatpush1.bf16.msra.mxu1 %v4843_v13  ;;  %3043 = vmatprep.subr.bf16.mxu0 %v4848_v14  ;;  %v4921_v13 = vld [vmem:[#allocation2 + $0x498] ss:$20 sps:$4 sm:$0xff]  }
 0x149   :  { %3086 = vmatprep.subr.bf16.mxu1 %v4851_v16  ;;  %v4922_v14 = vld [vmem:[#allocation2 + $0xd8] ss:$20 sps:$4 sm:$0xff]  }
 0x14a   :  { %v4923_v16 = vld [vmem:[#allocation2 + $0x358] ss:$20 sps:$4 sm:$0xff]  }
 0x14b   :  { %3044 = vmatpush1.bf16.msra.mxu0 %v4846_v17  ;;  %v4924_v17 = vld [vmem:[#allocation2 + $0x1f0] ss:$20 sps:$4 sm:$0xff]  }
 0x14c   :  { %3087 = vmatpush1.bf16.msra.mxu1 %v4849_v18  ;;  %3045 = vmatprep.subr.bf16.mxu0 %v4854_v19  ;;  %v4925_v18 = vld [vmem:[#allocation2 + $0x470] ss:$20 sps:$4 sm:$0xff]  }
 0x14d   :  { %3088 = vmatprep.subr.bf16.mxu1 %v4857_v20  ;;  %v4926_v19 = vld [vmem:[#allocation2 + $0xb0] ss:$20 sps:$4 sm:$0xff]  }
 0x14e   :  { %v4927_v20 = vld [vmem:[#allocation2 + $0x330] ss:$20 sps:$4 sm:$0xff]  }
 0x14f   :  { %3046 = vmatpush1.bf16.msra.mxu0 %v4852_v21  ;;  %v4928_v21 = vld [vmem:[#allocation2 + $0x1c8] ss:$20 sps:$4 sm:$0xff]  }
 0x150   :  { %3089 = vmatpush1.bf16.msra.mxu1 %v4855_v22  ;;  %3047 = vmatprep.subr.bf16.mxu0 %v4860_v23  ;;  %v4929_v22 = vld [vmem:[#allocation2 + $0x448] ss:$20 sps:$4 sm:$0xff]  }
 0x151   :  { %3090 = vmatprep.subr.bf16.mxu1 %v4863_v24  ;;  %v4930_v23 = vld [vmem:[#allocation2 + $0x88] ss:$20 sps:$4 sm:$0xff]   ;;  %v4933_v24 = vld [vmem:[#allocation2 + $0x420] ss:$20 sps:$4 sm:$0xff]  }
 0x153   :  { %3048 = vmatpush1.bf16.msra.mxu0 %v4858_v25  ;;  %v4934_v25 = vld [vmem:[#allocation2 + $0x60] ss:$20 sps:$4 sm:$0xff]  }
 0x154   :  { %3091 = vmatpush1.bf16.msra.mxu1 %v4861_v26  ;;  %3049 = vmatprep.subr.bf16.mxu0 %v4866_v27  ;;  %v4935_v26 = vld [vmem:[#allocation2 + $0x2e0] ss:$20 sps:$4 sm:$0xff]   ;;  %v4936_v27 = vld [vmem:[#allocation2 + $0x178] ss:$20 sps:$4 sm:$0xff]  }
 0x155   :  { %3092 = vmatprep.subr.bf16.mxu1 %v4869_v29  ;;  %v4937_v29 = vld [vmem:[#allocation2 + $0x3f8] ss:$20 sps:$4 sm:$0xff]  }
 0x157   :  { %3050 = vmatpush2.bf16.msra.mxu0 %v4864_v30  ;;  %v4938_v30 = vld [vmem:[#allocation2 + $0x38] ss:$20 sps:$4 sm:$0xff]  }
 0x158   :  { %3093 = vmatpush2.bf16.msra.mxu1 %v4867_v32  ;;  %3051 = vmatprep.subr.bf16.mxu0 %v4872_v33  ;;  %v4939_v32 = vld [vmem:[#allocation2 + $0x2b8] ss:$20 sps:$4 sm:$0xff]   ;;  %v4940_v33 = vld [vmem:[#allocation2 + $0x150] ss:$20 sps:$4 sm:$0xff]  }
 0x159   :  { %3094 = vmatprep.subr.bf16.mxu1 %v4875_v34  ;;  %v4941_v34 = vld [vmem:[#allocation2 + $0x3d0] ss:$20 sps:$4 sm:$0xff]  }
 0x15b   :  { %3052 = vmatpush2.bf16.msra.mxu0 %v4870_v35  ;;  %v4942_v35 = vld [vmem:[#allocation2 + $0x10] ss:$20 sps:$4 sm:$0xff]  }
 0x15c   :  { %3095 = vmatpush2.bf16.msra.mxu1 %v4873_v36  ;;  %3053 = vmatprep.subr.bf16.mxu0 %v4878_v37  ;;  %v4943_v36 = vld [vmem:[#allocation2 + $0x290] ss:$20 sps:$4 sm:$0xff]   ;;  %v4944_v37 = vld [vmem:[#allocation2 + $0x768] ss:$20 sps:$4 sm:$0xff]  }
 0x15d   :  { %3096 = vmatprep.subr.bf16.mxu1 %v4881_v38  ;;  %v4945_v38 = vld [vmem:[#allocation2 + $0x9e8] ss:$20 sps:$4 sm:$0xff]  }
 0x15f   :  { %3054 = vmatpush2.bf16.msra.mxu0 %v4876_v39  ;;  %v4946_v39 = vld [vmem:[#allocation2 + $0x628] ss:$20 sps:$4 sm:$0xff]  }
 0x160   :  { %3097 = vmatpush2.bf16.msra.mxu1 %v4879_v41  ;;  %3055 = vmatprep.subr.bf16.mxu0 %v4884_v42  ;;  %v4947_v41 = vld [vmem:[#allocation2 + $0x8a8] ss:$20 sps:$4 sm:$0xff]   ;;  %v4948_v42 = vld [vmem:[#allocation2 + $0x740] ss:$20 sps:$4 sm:$0xff]  }
 0x161   :  { %3098 = vmatprep.subr.bf16.mxu1 %v4887_v43  ;;  %v4949_v43 = vld [vmem:[#allocation2 + $0x9c0] ss:$20 sps:$4 sm:$0xff]  }
 0x163   :  { %3056 = vmatpush2.bf16.msra.mxu0 %v4882_v46  ;;  %v4950_v46 = vld [vmem:[#allocation2 + $0x600] ss:$20 sps:$4 sm:$0xff]  }
 0x164   :  { %3099 = vmatpush2.bf16.msra.mxu1 %v4885_v48  ;;  %3057 = vmatprep.subr.bf16.mxu0 %v4890_v49  ;;  %v4951_v48 = vld [vmem:[#allocation2 + $0x880] ss:$20 sps:$4 sm:$0xff]   ;;  %v4952_v49 = vld [vmem:[#allocation2 + $0x718] ss:$20 sps:$4 sm:$0xff]  }
 0x165   :  { %3100 = vmatprep.subr.bf16.mxu1 %v4893_v51  ;;  %v4953_v51 = vld [vmem:[#allocation2 + $0x998] ss:$20 sps:$4 sm:$0xff]  }
 0x167   :  { %3058 = vmatpush2.bf16.msra.mxu0 %v4888_v52  ;;  %v5276_v52 = vpop.f32.mrf.mxu0 }
 0x168   :  { %3101 = vmatpush2.bf16.msra.mxu1 %v4891_v53  ;;  %3059 = vmatprep.subr.bf16.mxu0 %v4896_v54  ;;  %v4954_v53 = vld [vmem:[#allocation2 + $0x5d8] ss:$20 sps:$4 sm:$0xff]   ;;  %v4957_v54 = vld [vmem:[#allocation2 + $0x970] ss:$20 sps:$4 sm:$0xff]  }
 0x169   :  { %3102 = vmatprep.subr.bf16.mxu1 %v4899_v56  ;;  %v2725_v56 = vpop.f32.mrf.mxu0 }
 0x16b   :  { %3060 = vmatpush2.bf16.msra.mxu0 %v4894_v57  ;;  %v5278_v57 = vpop.f32.mrf.mxu1 }
 0x16c   :  { %3103 = vmatpush2.bf16.msra.mxu1 %v4897_v58  ;;  %3061 = vmatprep.subr.bf16.mxu0 %v4902_v59  ;;  %v584_v58 = vlaneseq  ;;  %v4958_v59 = vld [vmem:[#allocation2 + $0x5b0] ss:$20 sps:$4 sm:$0xff]  }
 0x16d   :  { %3104 = vmatprep.subr.bf16.mxu1 %v4905_v60  ;;  %v4961_v60 = vld [vmem:[#allocation2 + $0x948] ss:$20 sps:$4 sm:$0xff]  }
 0x16f   :  { %3062 = vmatpush2.bf16.msra.mxu0 %v4900_v61  ;;  %v5280_v61 = vpop.f32.mrf.mxu0 }
 0x170   :  { %3105 = vmatpush2.bf16.msra.mxu1 %v4903_v62  ;;  %3063 = vmatprep.subr.bf16.mxu0 %v4908_v63  ;;  %v2768_v62 = vpop.f32.mrf.mxu1  ;;  %v5282_v63 = vshrl.u32 %v584_v58, 7  ;;  %v4987_v58 = vld [vmem:[#allocation6 + $0x28] sm:$0xff]  }
 0x171   :  { %3106 = vmatprep.subr.bf16.mxu1 %v4911_v0  ;;  %v4962_v0 = vld [vmem:[#allocation2 + $0x588] ss:$20 sps:$4 sm:$0xff]  }
 0x173   :  { %3064 = vmatpush2.bf16.msra.mxu0 %v4906_v1  ;;  %v4963_v1 = vld [vmem:[#allocation2 + $0x808] ss:$20 sps:$4 sm:$0xff]  }
 0x174   :  { %3107 = vmatpush2.bf16.msra.mxu1 %v4909_v2  ;;  %4239 = vmatprep.subr.bf16.mxu0 %v4912_v3  ;;  %v4964_v2 = vld [vmem:[#allocation2 + $0x6a0] ss:$20 sps:$4 sm:$0xff]  }
 0x175   :  { %4261 = vmatprep.subr.bf16.mxu1 %v4913_v4  ;;  %v4965_v3 = vld [vmem:[#allocation2 + $0x920] ss:$20 sps:$4 sm:$0xff]   ;;  %v2729_v4 = vpop.f32.mrf.mxu0 }
 0x176   :  { %3066 = vmatmul.mubr.bf16.vlgmr.msra.gmra.mxu0 %v5238_v31 }
 0x177   :  { %3109 = vmatmul.mubr.bf16.vlgmr.msra.gmra.mxu1 %v5258_v45  ;;  %4240 = vmatpush3.bf16.msra.mxu0 %v4914_v5  ;;  %v5284_v5 = vpop.f32.mrf.mxu1 }
 0x178   :  { %4262 = vmatpush3.bf16.msra.mxu1 %v4915_v6  ;;  %4241 = vmatprep.subr.bf16.mxu0 %v4916_v7  ;;  %v590_v6 = vsub.s32 1, %v5282_v63  ;;  %v4966_v7 = vld [vmem:[#allocation2 + $0x560] ss:$20 sps:$4 sm:$0xff]  }
 0x179   :  { %4263 = vmatprep.subr.bf16.mxu1 %v4917_v8  ;;  %3151 = vmatprep.mubr.bf16.mxu0 %v5176_v50  ;;  %v4931_v50 = vld [vmem:[#allocation2 + $0x308] ss:$20 sps:$4 sm:$0xff]   ;;  %v4967_v8 = vld [vmem:[#allocation2 + $0x7e0] ss:$20 sps:$4 sm:$0xff]  }
 0x17a   :  { %3192 = vmatprep.mubr.bf16.mxu1 %v5184_v55  ;;  %v4932_v55 = vld [vmem:[#allocation2 + $0x1a0] ss:$20 sps:$4 sm:$0xff]  }
 0x17b   :  { %4242 = vmatpush3.bf16.msra.mxu0 %v4918_v9  ;;  %v5287_v9 = vld [vmem:[#allocation4] sm:$0x1f] }
 0x17c   :  { %4264 = vmatpush3.bf16.msra.mxu1 %v4919_v10  ;;  %4243 = vmatprep.subr.bf16.mxu0 %v4920_v11  ;;  %v5289_v10 = vpop.f32.mrf.mxu0  ;;  %v4968_v11 = vld [vmem:[#allocation2 + $0x678] ss:$20 sps:$4 sm:$0xff]  }
 0x17d   :  { %4265 = vmatprep.subr.bf16.mxu1 %v4921_v13  ;;  %v4969_v13 = vld [vmem:[#allocation2 + $0x8f8] ss:$20 sps:$4 sm:$0xff]  }
 0x17f   :  { %4244 = vmatpush3.bf16.msra.mxu0 %v4922_v14  ;;  %v2772_v14 = vpop.f32.mrf.mxu1 }
 0x180   :  { %4266 = vmatpush3.bf16.msra.mxu1 %v4923_v16  ;;  %4245 = vmatprep.subr.bf16.mxu0 %v4924_v17  ;;  %v591_v16 = vrot.slane %v5287_v9, %v590_v6  ;;  %v4970_v17 = vld [vmem:[#allocation2 + $0x538] ss:$20 sps:$4 sm:$0xff]  }
 0x181   :  { %4267 = vmatprep.subr.bf16.mxu1 %v4925_v18  ;;  %v4971_v18 = vld [vmem:[#allocation2 + $0x7b8] ss:$20 sps:$4 sm:$0xff]  }
 0x183   :  { %4246 = vmatpush3.bf16.msra.mxu0 %v4926_v19  ;;  %v2811_v19 = vpop.f32.mrf.mxu0 }
 0x184   :  { %4268 = vmatpush3.bf16.msra.mxu1 %v4927_v20  ;;  %4247 = vmatprep.subr.bf16.mxu0 %v4928_v21  ;;  %v5292_v20 = vpop.f32.mrf.mxu1  ;;  %v4972_v21 = vld [vmem:[#allocation2 + $0x650] ss:$20 sps:$4 sm:$0xff]  }
 0x185   :  { %4269 = vmatprep.subr.bf16.mxu1 %v4929_v22  ;;  %v4973_v22 = vld [vmem:[#allocation2 + $0x8d0] ss:$20 sps:$4 sm:$0xff]  }
 0x187   :  { %4248 = vmatpush3.bf16.msra.mxu0 %v4930_v23  ;;  %v2726_v23 = vadd.f32 %v2725_v56, %v591_v16 }
 0x188   :  { %4270 = vmatpush3.bf16.msra.mxu1 %v4931_v50  ;;  %4249 = vmatprep.subr.bf16.mxu0 %v4932_v55  ;;  %v4974_v50 = vld [vmem:[#allocation2 + $0x510] ss:$20 sps:$4 sm:$0xff]  }
 0x189   :  { %4271 = vmatprep.subr.bf16.mxu1 %v4933_v24  ;;  %v4975_v55 = vld [vmem:[#allocation2 + $0x790] ss:$20 sps:$4 sm:$0xff]   ;;  %v5294_v24 = vpop.f32.mrf.mxu0 }
 0x18b   :  { %4250 = vmatpush3.bf16.msra.mxu0 %v4934_v25  ;;  %v2854_v25 = vpop.f32.mrf.mxu1 }
 0x18c   :  { %4272 = vmatpush3.bf16.msra.mxu1 %v4935_v26  ;;  %4251 = vmatprep.subr.bf16.mxu0 %v4936_v27  ;;  %v4976_v26 = vld [vmem:[#allocation2 + $0xc68] ss:$20 sps:$4 sm:$0xff]  }
 0x18d   :  { %4273 = vmatprep.subr.bf16.mxu1 %v4937_v29  ;;  %v4977_v27 = vld [vmem:[#allocation6 + $0x78] sm:$0xff]   ;;  %v2730_v29 = vadd.f32 %v2729_v4, %v591_v16 }
 0x18e   :  { %v4992_v4 = vld [vmem:[#allocation2 + $0xbc8] ss:$20 sps:$4 sm:$0xff]   ;;  %v4996_v16 = vld [vmem:[#allocation2 + $0xba0] ss:$20 sps:$4 sm:$0xff]  }
 0x18f   :  { %4252 = vmatpush3.bf16.msra.mxu0 %v4938_v30  ;;  %v2769_v30 = vadd.f32 %v2768_v62, %v2726_v23  ;;  %v5001_v23 = vld [vmem:[#allocation6 + $0x48] sm:$0xff]  }
 0x190   :  { %4274 = vmatpush3.bf16.msra.mxu1 %v4939_v32  ;;  %4253 = vmatprep.subr.bf16.mxu0 %v4940_v33  ;;  %v4978_v32 = vld [vmem:[#allocation2 + $0xb28] ss:$20 sps:$4 sm:$0xff]  }
 0x191   :  { %4275 = vmatprep.subr.bf16.mxu1 %v4941_v34  ;;  %v4979_v33 = vld [vmem:[#allocation6 + $0x38] sm:$0xff]   ;;  %v2815_v34 = vpop.f32.mrf.mxu0 }
 0x193   :  { %4254 = vmatpush3.bf16.msra.mxu0 %v4942_v35  ;;  %v5296_v35 = vpop.f32.mrf.mxu1 }
 0x194   :  { %4276 = vmatpush3.bf16.msra.mxu1 %v4943_v36  ;;  %4283 = vmatprep.subr.bf16.mxu0 %v4944_v37  ;;  %v4980_v36 = vld [vmem:[#allocation2 + $0xc40] ss:$20 sps:$4 sm:$0xff]  }
 0x195   :  { %4305 = vmatprep.subr.bf16.mxu1 %v4945_v38  ;;  %v4981_v37 = vld [vmem:[#allocation6 + $0x70] sm:$0xff]   ;;  %v2773_v38 = vadd.f32 %v2772_v14, %v2730_v29  ;;  %v5007_v29 = vld [vmem:[#allocation6] sm:$0xff]  }
 0x196   :  { %3152 = vmatmul.mubr.bf16.vlgmr.msra.gmra.mxu0 %v5200_v12  ;;  %v4955_v12 = vld [vmem:[#allocation2 + $0x858] ss:$20 sps:$4 sm:$0xff]  }
 0x197   :  { %3193 = vmatmul.mubr.bf16.vlgmr.msra.gmra.mxu1 %v5202_v15  ;;  %4284 = vmatpush3.bf16.msra.mxu0 %v4946_v39  ;;  %v4956_v15 = vld [vmem:[#allocation2 + $0x6f0] ss:$20 sps:$4 sm:$0xff]   ;;  %v2812_v39 = vadd.f32 %v2811_v19, %v2769_v30  ;;  %v4998_v19 = vld [vmem:[#allocation2 + $0xa60] ss:$20 sps:$4 sm:$0xff]  }
 0x198   :  { %4306 = vmatpush3.bf16.msra.mxu1 %v4947_v41  ;;  %4285 = vmatprep.subr.bf16.mxu0 %v4948_v42  ;;  %v2816_v42 = vadd.f32 %v2815_v34, %v2773_v38  ;;  %v5009_v34 = vld [vmem:[#allocation6 + $0xb8] sm:$0xff]   ;;  %v5013_v38 = vld [vmem:[#allocation6 + $0xa8] sm:$0xff]  }
 0x199   :  { %4307 = vmatprep.subr.bf16.mxu1 %v4949_v43  ;;  %3233 = vmatprep.mubr.bf16.mxu0 %v5212_v44  ;;  %v4959_v44 = vld [vmem:[#allocation2 + $0x830] ss:$20 sps:$4 sm:$0xff]   ;;  %v4982_v43 = vld [vmem:[#allocation2 + $0xb00] ss:$20 sps:$4 sm:$0xff]  }
 0x19a   :  { %3274 = vmatprep.mubr.bf16.mxu1 %v5220_v47  ;;  %v4960_v47 = vld [vmem:[#allocation2 + $0x6c8] ss:$20 sps:$4 sm:$0xff]  }
 0x19b   :  { %4286 = vmatpush3.bf16.msra.mxu0 %v4950_v46  ;;  %v4983_v46 = vld [vmem:[#allocation6 + $0x30] sm:$0xff]  }
 0x19c   :  { %4308 = vmatpush3.bf16.msra.mxu1 %v4951_v48  ;;  %4287 = vmatprep.subr.bf16.mxu0 %v4952_v49  ;;  %v2858_v48 = vpop.f32.mrf.mxu1 }
 0x19d   :  { %4309 = vmatprep.subr.bf16.mxu1 %v4953_v51  ;;  %v4984_v51 = vld [vmem:[#allocation2 + $0xc18] ss:$20 sps:$4 sm:$0xff]  }
 0x19f   :  { %4288 = vmatpush3.bf16.msra.mxu0 %v4954_v53  ;;  %v4985_v53 = vld [vmem:[#allocation6 + $0x68] sm:$0xff]  }
 0x1a0   :  { %4310 = vmatpush3.bf16.msra.mxu1 %v4955_v12  ;;  %4289 = vmatprep.subr.bf16.mxu0 %v4956_v15  ;;  %v2855_v12 = vadd.f32 %v2854_v25, %v2812_v39  ;;  %v586_v15 = vsub.s32 0, %v5282_v63  ;;  %v5014_v39 = vld [vmem:[#allocation6 + $0xe0] sm:$0xff]  }
 0x1a1   :  { %4311 = vmatprep.subr.bf16.mxu1 %v4957_v54 }
 0x1a2   :  { %v587_v62 = vrot.slane %v5287_v9, %v586_v15  ;;  %v5126_v15 = vmov 0.0  }
 0x1a3   :  { %4290 = vmatpush3.bf16.msra.mxu0 %v4958_v59 }
 0x1a4   :  { %4312 = vmatpush3.bf16.msra.mxu1 %v4959_v44  ;;  %4291 = vmatprep.subr.bf16.mxu0 %v4960_v47  ;;  %v4988_v44 = vld [vmem:[#allocation2 + $0xbf0] ss:$20 sps:$4 sm:$0xff]  }
 0x1a5   :  { %4313 = vmatprep.subr.bf16.mxu1 %v4961_v60  ;;  %v4989_v47 = vld [vmem:[#allocation6 + $0x60] sm:$0xff]  }
 0x1a7   :  { %4292 = vmatpush3.bf16.msra.mxu0 %v4962_v0 }
 0x1a8   :  { %4314 = vmatpush3.bf16.msra.mxu1 %v4963_v1  ;;  %4293 = vmatprep.subr.bf16.mxu0 %v4964_v2  ;;  %v4991_v2 = vld [vmem:[#allocation6 + $0x20] sm:$0xff]  }
 0x1a9   :  { %4315 = vmatprep.subr.bf16.mxu1 %v4965_v3  ;;  %v2728_v3 = vadd.f32 %v5280_v61, %v587_v62 }
 0x1ab   :  { %4294 = vmatpush3.bf16.msra.mxu0 %v4966_v7  ;;  %v4993_v7 = vld [vmem:[#allocation6 + $0x58] sm:$0xff]   ;;  %v2771_v14 = vadd.f32 %v5284_v5, %v2728_v3  ;;  %v594_v3 = vsub.s32 2, %v5282_v63 }
 0x1ac   :  { %4316 = vmatpush3.bf16.msra.mxu1 %v4967_v8  ;;  %4295 = vmatprep.subr.bf16.mxu0 %v4968_v11  ;;  %v2724_v8 = vadd.f32 %v5276_v52, %v587_v62  ;;  %v4994_v11 = vld [vmem:[#allocation2 + $0xa88] ss:$20 sps:$4 sm:$0xff]  }
 0x1ad   :  { %4317 = vmatprep.subr.bf16.mxu1 %v4969_v13  ;;  %v4995_v13 = vld [vmem:[#allocation6 + $0x18] sm:$0xff]  }
 0x1ae   :  { %v2767_v61 = vadd.f32 %v5278_v57, %v2724_v8  ;;  %v595_v8 = vrot.slane %v5287_v9, %v594_v3 }
 0x1af   :  { %4296 = vmatpush3.bf16.msra.mxu0 %v4970_v17  ;;  %v4997_v17 = vld [vmem:[#allocation6 + $0x50] sm:$0xff]  }
 0x1b0   :  { %4318 = vmatpush3.bf16.msra.mxu1 %v4971_v18  ;;  %4297 = vmatprep.subr.bf16.mxu0 %v4972_v21  ;;  %v2814_v18 = vadd.f32 %v5294_v24, %v2771_v14  ;;  %v4999_v21 = vld [vmem:[#allocation6 + $0x10] sm:$0xff]   ;;  %v2810_v52 = vadd.f32 %v5289_v10, %v2767_v61  ;;  %v5004_v24 = vld [vmem:[#allocation2 + $0xb50] ss:$20 sps:$4 sm:$0xff]  }
 0x1b1   :  { %4319 = vmatprep.subr.bf16.mxu1 %v4973_v22  ;;  %v5000_v22 = vld [vmem:[#allocation2 + $0xb78] ss:$20 sps:$4 sm:$0xff]   ;;  %v5006_v10 = vld [vmem:[#allocation2 + $0xa10] ss:$20 sps:$4 sm:$0xff]  }
 0x1b2   :  { %v2857_v5 = vadd.f32 %v5296_v35, %v2814_v18  ;;  %v2853_v57 = vadd.f32 %v5292_v20, %v2810_v52  ;;  %v5010_v35 = vld [vmem:[#allocation6 + $0xf0] sm:$0xff]  }
 0x1b3   :  { %4298 = vmatpush3.bf16.msra.mxu0 %v4974_v50  ;;  %v5002_v50 = vld [vmem:[#allocation2 + $0xa38] ss:$20 sps:$4 sm:$0xff]  }
 0x1b4   :  { %4320 = vmatpush3.bf16.msra.mxu1 %v4975_v55  ;;  %4327 = vmatprep.subr.bf16.mxu0 %v4976_v26  ;;  %v5003_v55 = vld [vmem:[#allocation6 + $0x8] sm:$0xff]   ;;  %v5005_v26 = vld [vmem:[#allocation6 + $0x40] sm:$0xff]  }
 0x1b5   :  { %4349 = vmatprep.subr.bf16.mxu1 %v4977_v27 }
 0x1b6   :  { %v5298_v41 = vpop.f32.mrf.mxu0  ;;  %3234 = vmatmul.mubr.bf16.vlgmr.msra.gmra.mxu0 %v5236_v28  ;;  %v2859_v28 = vadd.f32 %v2858_v48, %v2816_v42  ;;  %v5016_v42 = vld [vmem:[#allocation6 + $0xd8] sm:$0xff]   ;;  %v5019_v48 = vld [vmem:[#allocation6 + $0x90] sm:$0xff]  }
 0x1b7   :  { %3275 = vmatmul.mubr.bf16.vlgmr.msra.gmra.mxu1 %v5238_v31  ;;  %4328 = vmatpush3.bf16.msra.mxu0 %v4978_v32  ;;  %v4986_v31 = vld [vmem:[#allocation2 + $0xad8] ss:$20 sps:$4 sm:$0xff]   ;;  %v2896_v27 = vadd.f32 %v5298_v41, %v2853_v57  ;;  %v5008_v32 = vld [vmem:[#allocation6 + $0xf8] sm:$0xff]  }
 0x1b8   :  { %4350 = vmatpush3.bf16.msra.mxu1 %v4979_v33  ;;  %v2897_v49 = vpop.f32.mrf.mxu0  ;;  %4329 = vmatprep.subr.bf16.mxu0 %v4980_v36  ;;  %v5011_v36 = vld [vmem:[#allocation6 + $0xb0] sm:$0xff]   ;;  %v5015_v41 = vld [vmem:[#allocation6 + $0xa0] sm:$0xff]  }
 0x1b9   :  { %4351 = vmatprep.subr.bf16.mxu1 %v4981_v37  ;;  %3315 = vmatprep.mubr.bf16.mxu0 %v5248_v40  ;;  %v2898_v56 = vadd.f32 %v2897_v49, %v2855_v12  ;;  %v4990_v40 = vld [vmem:[#allocation2 + $0xab0] ss:$20 sps:$4 sm:$0xff]   ;;  %v3324_v33 = vmax.f32 %v2896_v27, 0.0 }
 0x1ba   :  { %v2899_v54 = vpop.f32.mrf.mxu0  ;;  %v5012_v37 = vld [vmem:[#allocation6 + $0xe8] sm:$0xff]   ;;  %v5024_v12 = vld [vmem:[#allocation6 + $0x138] sm:$0xff]  }
 0x1bb   :  { %4330 = vmatpush3.bf16.msra.mxu0 %v4982_v43  ;;  %v3325_v0 = vmax.f32 %v2898_v56, 0.0  ;;  %v2900_v25 = vadd.f32 %v2899_v54, %v2857_v5  ;;  %v5017_v43 = vld [vmem:[#allocation6 + $0x98] sm:$0xff]   ;;  %v5021_v49 = vld [vmem:[#allocation6 + $0x88] sm:$0xff]   ;;  %v5025_v54 = vld [vmem:[#allocation6 + $0x130] sm:$0xff]  }
 0x1bc   :  { %4352 = vmatpush3.bf16.msra.mxu1 %v4983_v46  ;;  %v2901_v59 = vpop.f32.mrf.mxu0  ;;  %4331 = vmatprep.subr.bf16.mxu0 %v4984_v51  ;;  %v5018_v46 = vld [vmem:[#allocation6 + $0xd0] sm:$0xff]   ;;  %v5022_v51 = vld [vmem:[#allocation6 + $0xc0] sm:$0xff]  }
 0x1bd   :  { %4353 = vmatprep.subr.bf16.mxu1 %v4985_v53  ;;  %v2902_v60 = vadd.f32 %v2901_v59, %v2859_v28  ;;  %v3329_v30 = vmax.f32 %v2900_v25, 0.0  ;;  %v5023_v53 = vld [vmem:[#allocation6 + $0x80] sm:$0xff]   ;;  %v5026_v28 = vld [vmem:[#allocation6 + $0x128] sm:$0xff]   ;;  %v2938_v59 = vpop.f32.mrf.mxu1 }
 0x1be   :  { %v5027_v56 = vld [vmem:[#allocation6 + $0x120] sm:$0xff]  }
 0x1bf   :  { %v3330_v1 = vmax.f32 %v2902_v60, 0.0  ;;  %4332 = vmatpush3.bf16.msra.mxu0 %v4986_v31  ;;  %v3334_v20 = vpack.c.bf16 %v3329_v30, %v3324_v33  ;;  %v5028_v31 = vld [vmem:[#allocation6 + $0x118] sm:$0xff]   ;;  %v5031_v60 = vld [vmem:[#allocation6 + $0x100] sm:$0xff]  }
 0x1c0   :  { %4354 = vmatpush3.bf16.msra.mxu1 %v4987_v58  ;;  %4333 = vmatprep.subr.bf16.mxu0 %v4988_v44  ;;  %v5029_v58 = vld [vmem:[#allocation6 + $0x110] sm:$0xff]   ;;  %v5030_v44 = vld [vmem:[#allocation6 + $0x108] sm:$0xff]  }
 0x1c1   :  { %4355 = vmatprep.subr.bf16.mxu1 %v4989_v47  ;;  %v3335_v6 = vpack.c.bf16 %v3330_v1, %v3325_v0  ;;  %v2940_v47 = vpop.f32.mrf.mxu1 }
 0x1c3   :  { %4334 = vmatpush3.bf16.msra.mxu0 %v4990_v40  ;;  %3698 = vmatprep.mubr.bf16.mxu1 %v3335_v6  ;;  %v2942_v62 = vpop.f32.mrf.mxu1 }
 0x1c4   :  { %4356 = vmatpush3.bf16.msra.mxu1 %v4991_v2  ;;  %4335 = vmatprep.subr.bf16.mxu0 %v4992_v4  ;;  %v598_v2 = vsub.s32 3, %v5282_v63 }
 0x1c5   :  { %4357 = vmatprep.subr.bf16.mxu1 %v4993_v7  ;;  %v2944_v0 = vpop.f32.mrf.mxu1 }
 0x1c6   :  { %v599_v7 = vrot.slane %v5287_v9, %v598_v2 }
 0x1c7   :  { %4336 = vmatpush3.bf16.msra.mxu0 %v4994_v11 }
 0x1c8   :  { %4358 = vmatpush3.bf16.msra.mxu1 %v4995_v13  ;;  %4337 = vmatprep.subr.bf16.mxu0 %v4996_v16  ;;  %v2941_v14 = vadd.f32 %v2940_v47, %v599_v7  ;;  %v2939_v16 = vadd.f32 %v2938_v59, %v595_v8  ;;  %v2945_v52 = vadd.f32 %v2944_v0, %v599_v7 }
 0x1c9   :  { %4359 = vmatprep.subr.bf16.mxu1 %v4997_v17  ;;  %v2943_v17 = vadd.f32 %v2942_v62, %v595_v8 }
 0x1cb   :  { %4338 = vmatpush3.bf16.msra.mxu0 %v4998_v19 }
 0x1cc   :  { %4360 = vmatpush3.bf16.msra.mxu1 %v4999_v21  ;;  %4339 = vmatprep.subr.bf16.mxu0 %v5000_v22 }
 0x1cd   :  { %4361 = vmatprep.subr.bf16.mxu1 %v5001_v23 }
 0x1cf   :  { %4340 = vmatpush3.bf16.msra.mxu0 %v5002_v50 }
 0x1d0   :  { %4362 = vmatpush3.bf16.msra.mxu1 %v5003_v55  ;;  %4341 = vmatprep.subr.bf16.mxu0 %v5004_v24 }
 0x1d1   :  { %4363 = vmatprep.subr.bf16.mxu1 %v5005_v26 }
 0x1d3   :  { %4342 = vmatpush3.bf16.msra.mxu0 %v5006_v10 }
 0x1d4   :  { %4364 = vmatpush3.bf16.msra.mxu1 %v5007_v29  ;;  %4371 = vmatprep.subr.bf16.mxu0 %v5008_v32 }
 0x1d5   :  { %4402 = vmatprep.subr.bf16.mxu1 %v5126_v15 }
 0x1d6   :  { %3316 = vmatmul.mubr.bf16.vlgmr.msra.gmra.mxu0 %v5258_v45  ;;  %v5020_v45 = vld [vmem:[#allocation6 + $0xc8] sm:$0xff]  }
 0x1d7   :  { %3699 = vmatmul.mubr.bf16.vlgmr.msra.gmra.mxu1 %v3334_v20  ;;  %4372 = vmatpush3.bf16.msra.mxu0 %v5009_v34 }
 0x1d8   :  { %4373 = vmatprep.subr.bf16.mxu0 %v5010_v35  ;;  %4403 = vmatpush3.bf16.msra.mxu1 %v5024_v12 }
 0x1d9   :  { %4404 = vmatprep.subr.bf16.mxu1 %v5126_v15  ;;  %4418 = vmatprep.mubr.msk.bf16.mxu1 %vm5127_vm0, %v5126_v15 }
 0x1db   :  { %4374 = vmatpush3.bf16.msra.mxu0 %v5011_v36 }
 0x1dc   :  { %4375 = vmatprep.subr.bf16.mxu0 %v5012_v37  ;;  %4405 = vmatpush3.bf16.msra.mxu1 %v5025_v54 }
 0x1dd   :  { %4406 = vmatprep.subr.bf16.mxu1 %v5126_v15 }
 0x1df   :  { %4376 = vmatpush3.bf16.msra.mxu0 %v5013_v38 }
 0x1e0   :  { %4377 = vmatprep.subr.bf16.mxu0 %v5014_v39  ;;  %4407 = vmatpush3.bf16.msra.mxu1 %v5026_v28 }
 0x1e1   :  { %4408 = vmatprep.subr.bf16.mxu1 %v5126_v15 }
 0x1e3   :  { %4378 = vmatpush3.bf16.msra.mxu0 %v5015_v41 }
 0x1e4   :  { %4379 = vmatprep.subr.bf16.mxu0 %v5016_v42  ;;  %4409 = vmatpush3.bf16.msra.mxu1 %v5027_v56 }
 0x1e5   :  { %4410 = vmatprep.subr.bf16.mxu1 %v5126_v15 }
 0x1e7   :  { %4380 = vmatpush3.bf16.msra.mxu0 %v5017_v43 }
 0x1e8   :  { %4381 = vmatprep.subr.bf16.mxu0 %v5018_v46  ;;  %4411 = vmatpush3.bf16.msra.mxu1 %v5028_v31 }
 0x1e9   :  { %4412 = vmatprep.subr.bf16.mxu1 %v5126_v15 }
 0x1eb   :  { %4382 = vmatpush3.bf16.msra.mxu0 %v5019_v48 }
 0x1ec   :  { %4383 = vmatprep.subr.bf16.mxu0 %v5020_v45  ;;  %4413 = vmatpush3.bf16.msra.mxu1 %v5029_v58  ;;  %v602_v58 = vsub.s32 4, %v5282_v63 }
 0x1ed   :  { %4414 = vmatprep.subr.bf16.mxu1 %v5126_v15 }
 0x1ee   :  { %v603_v47 = vrot.slane %v5287_v9, %v602_v58 }
 0x1ef   :  { %4384 = vmatpush3.bf16.msra.mxu0 %v5021_v49 }
 0x1f0   :  { %4385 = vmatprep.subr.bf16.mxu0 %v5022_v51  ;;  %4415 = vmatpush3.bf16.msra.mxu1 %v5030_v44 }
 0x1f1   :  { %4416 = vmatprep.subr.bf16.mxu1 %v5126_v15 }
 0x1f3   :  { %4386 = vmatpush3.bf16.msra.mxu0 %v5023_v53 }
 0x1f4   :  { %4417 = vmatpush3.bf16.msra.mxu1 %v5031_v60 }
 0x1f6   :  { %v2981_v1 = vpop.f32.mrf.mxu0 }
 0x1f7   :  { %v3024_v40 = vpop.f32.mrf.mxu1  ;;  %v2982_v18 = vadd.f32 %v2981_v1, %v2939_v16 }
 0x1f8   :  { %v2983_v4 = vpop.f32.mrf.mxu0 }
 0x1f9   :  { %v3026_v6 = vpop.f32.mrf.mxu1  ;;  %v2984_v61 = vadd.f32 %v2983_v4, %v2941_v14  ;;  %v3025_v57 = vadd.f32 %v3024_v40, %v2982_v18 }
 0x1fa   :  { %v2985_v11 = vpop.f32.mrf.mxu0 }
 0x1fb   :  { %v3028_v13 = vpop.f32.mrf.mxu1  ;;  %v2986_v22 = vadd.f32 %v2985_v11, %v2943_v17  ;;  %v3027_v50 = vadd.f32 %v3026_v6, %v2984_v61 }
 0x1fc   :  { %v2987_v19 = vpop.f32.mrf.mxu0 }
 0x1fd   :  { %v3030_v21 = vpop.f32.mrf.mxu1  ;;  %v2988_v55 = vadd.f32 %v2987_v19, %v2945_v52  ;;  %v3029_v26 = vadd.f32 %v3028_v13, %v2986_v22 }
 0x1ff   :  { %v3031_v32 = vadd.f32 %v3030_v21, %v2988_v55 }
 0x236   :  { %v3067_v23 = vpop.f32.mrf.mxu0 }
 0x237   :  { %v3110_v5 = vpop.f32.mrf.mxu1  ;;  %v3068_v10 = vadd.f32 %v3067_v23, %v3025_v57 }
 0x238   :  { %v3069_v25 = vpop.f32.mrf.mxu0 }
 0x239   :  { %v3112_v24 = vpop.f32.mrf.mxu1  ;;  %v3070_v27 = vadd.f32 %v3069_v25, %v3027_v50  ;;  %v3111_v38 = vadd.f32 %v3110_v5, %v3068_v10 }
 0x23a   :  { %v3071_v29 = vpop.f32.mrf.mxu0 }
 0x23b   :  { %v3114_v30 = vpop.f32.mrf.mxu1  ;;  %v3072_v33 = vadd.f32 %v3071_v29, %v3029_v26  ;;  %v3113_v35 = vadd.f32 %v3112_v24, %v3070_v27  ;;  %v3326_v46 = vmax.f32 %v3111_v38, 0.0 }
 0x23c   :  { %v3073_v34 = vpop.f32.mrf.mxu0 }
 0x23d   :  { %v3116_v20 = vpop.f32.mrf.mxu1  ;;  %v3074_v36 = vadd.f32 %v3073_v34, %v3031_v32  ;;  %v3115_v37 = vadd.f32 %v3114_v30, %v3072_v33  ;;  %v3327_v42 = vmax.f32 %v3113_v35, 0.0 }
 0x23f   :  { %v3117_v39 = vadd.f32 %v3116_v20, %v3074_v36  ;;  %v3331_v41 = vmax.f32 %v3115_v37, 0.0  ;;  %v4198_v20 = vld [vmem:[#allocation7] ss:$0 sm:$0xff] }
 0x241   :  { %v3332_v43 = vmax.f32 %v3117_v39, 0.0  ;;  %v3336_v45 = vpack.c.bf16 %v3331_v41, %v3326_v46 }
 0x243   :  { %v3337_v48 = vpack.c.bf16 %v3332_v43, %v3327_v42 }
 0x245   :  { %3739 = vmatprep.mubr.bf16.mxu0 %v3337_v48 }
 0x246   :  { %3740 = vmatmul.mubr.bf16.vlgmr.msra.gmra.mxu0 %v3336_v45 }
 0x256   :  { %v4255_v49 = vpop.f32.mrf.mxu0 }
 0x257   :  { %v4277_v53 = vpop.f32.mrf.mxu1 }
 0x258   :  { %v4256_v51 = vpop.f32.mrf.mxu0 }
 0x259   :  { %v4278_v15 = vpop.f32.mrf.mxu1  ;;  %v4257_v60 = vadd.f32 %v4256_v51, %v4255_v49 }
 0x25a   :  { %v4258_v12 = vpop.f32.mrf.mxu0  ;;  %v4279_v2 = vadd.f32 %v4278_v15, %v4277_v53 }
 0x25b   :  { %v4280_v28 = vpop.f32.mrf.mxu1  ;;  %v3154_v40 = vadd.f32 %v4257_v60, %v603_v47 }
 0x25c   :  { %v4259_v54 = vpop.f32.mrf.mxu0 }
 0x25d   :  { %v4281_v31 = vpop.f32.mrf.mxu1  ;;  %v4260_v1 = vadd.f32 %v4259_v54, %v4258_v12  ;;  %v3195_v11 = vadd.f32 %v4279_v2, %v3154_v40 }
 0x25e   :  { %v4282_v7 = vadd.f32 %v4281_v31, %v4280_v28 }
 0x25f   :  { %v3157_v6 = vadd.f32 %v4260_v1, %v603_v47 }
 0x261   :  { %v3198_v63 = vadd.f32 %v4282_v7, %v3157_v6 }
 0x276   :  { %v4299_v56 = vpop.f32.mrf.mxu0 }
 0x277   :  { %v4321_v44 = vpop.f32.mrf.mxu1 }
 0x278   :  { %v4300_v59 = vpop.f32.mrf.mxu0 }
 0x279   :  { %v4322_v0 = vpop.f32.mrf.mxu1  ;;  %v4301_v8 = vadd.f32 %v4300_v59, %v4299_v56 }
 0x27a   :  { %v4302_v62 = vpop.f32.mrf.mxu0  ;;  %v4323_v61 = vadd.f32 %v4322_v0, %v4321_v44 }
 0x27b   :  { %v4324_v4 = vpop.f32.mrf.mxu1  ;;  %v3236_v17 = vadd.f32 %v4301_v8, %v3195_v11 }
 0x27c   :  { %v4303_v3 = vpop.f32.mrf.mxu0 }
 0x27d   :  { %v4304_v13 = vadd.f32 %v4303_v3, %v4302_v62  ;;  %v4325_v14 = vpop.f32.mrf.mxu1  ;;  %v3277_v22 = vadd.f32 %v4323_v61, %v3236_v17 }
 0x27e   :  { %v4326_v19 = vadd.f32 %v4325_v14, %v4324_v4 }
 0x27f   :  { %v3239_v9 = vadd.f32 %v4304_v13, %v3198_v63 }
 0x281   :  { %v3280_v5 = vadd.f32 %v4326_v19, %v3239_v9 }
 0x296   :  { %v4343_v16 = vpop.f32.mrf.mxu0 }
 0x297   :  { %v4365_v27 = vpop.f32.mrf.mxu1 }
 0x298   :  { %v4344_v18 = vpop.f32.mrf.mxu0 }
 0x299   :  { %v4345_v21 = vadd.f32 %v4344_v18, %v4343_v16  ;;  %v4366_v29 = vpop.f32.mrf.mxu1 }
 0x29a   :  { %v4346_v52 = vpop.f32.mrf.mxu0  ;;  %v4367_v34 = vadd.f32 %v4366_v29, %v4365_v27 }
 0x29b   :  { %v3318_v50 = vadd.f32 %v4345_v21, %v3277_v22  ;;  %v4368_v32 = vpop.f32.mrf.mxu1 }
 0x29c   :  { %v4347_v23 = vpop.f32.mrf.mxu0  ;;  %v3701_v38 = vadd.f32 %v4367_v34, %v4198_v20 }
 0x29d   :  { %v4348_v55 = vadd.f32 %v4347_v23, %v4346_v52  ;;  %v3328_v25 = vmax.f32 %v3318_v50, 0.0  ;;  %v4369_v35 = vpop.f32.mrf.mxu1 }
 0x29e   :  { %v4370_v39 = vadd.f32 %v4369_v35, %v4368_v32 }
 0x29f   :  { %v3321_v57 = vadd.f32 %v4348_v55, %v3280_v5 }
 0x2a0   :  { %v3704_v46 = vadd.f32 %v4370_v39, %v4198_v20 }
 0x2a1   :  { %v3333_v24 = vmax.f32 %v3321_v57, 0.0 }
 0x2a3   :  { %v3338_v26 = vpack.c.bf16 %v3333_v24, %v3328_v25 }
 0x2a5   :  { %4419 = vmatmul.mubr.bf16.vlgmr.msra.gmra.mxu1 %v3338_v26 }
 0x306   :  { %v4387_v10 = vpop.f32.mrf.mxu0 }
 0x308   :  { %v4388_v30 = vpop.f32.mrf.mxu0 }
 0x309   :  { %v4389_v36 = vadd.f32 %v4388_v30, %v4387_v10 }
 0x30a   :  { %v4390_v33 = vpop.f32.mrf.mxu0 }
 0x30b   :  { %v3742_v42 = vadd.f32 %v4389_v36, %v3701_v38 }
 0x30c   :  { %v4391_v37 = vpop.f32.mrf.mxu0 }
 0x30d   :  { %v4392_v41 = vadd.f32 %v4391_v37, %v4390_v33 }
 0x30f   :  { %v3745_v49 = vadd.f32 %v4392_v41, %v3704_v46 }
 0x365   :  { %v3782_v43 = vpop.f32.mrf.mxu1 }
 0x366   :  { %v3783_v48 = vadd.f32 %v3782_v43, %v3742_v42 }
 0x367   :  { %v4420_v45 = vpop.f32.mrf.mxu1 }
 0x368   :  { %3789 = vst [vmem:[%s5332_s5] sm:$0xff] %v3783_v48 }
 0x369   :  { %v3785_v51 = vpop.f32.mrf.mxu1 }
 0x36a   :  { %v3786_v53 = vadd.f32 %v3785_v51, %v3745_v49 }
 0x36b   :  { %v4421_v12 = vpop.f32.mrf.mxu1 }
 0x36c   :  { %3790 = vst [vmem:[%s5332_s5 + $0x8] sm:$0xff] %v3786_v53 }
 0x36d   :  { %3795 = vsyncpa [#allocation3], 1 }
 0x36e   :  { %3796 = vsyncpa [#allocation5], 1 }
 0x36f   :  { %3797 = vsyncpa [#allocation8], 1 }

</bundles_post_ra>
